<compile_context>
chip_gen: v7x
topology: tpu7x:2x2x1
jax: 0.10.0
libtpu: 0.0.40
codegen_flags: <defaults>
</compile_context>

<pallas_src>
import jax
import jax.numpy as jnp
from jax.experimental import pallas as pl
from jax.experimental.pallas import tpu as pltpu

NEG_SLOPE = 0.01   # nn.LeakyReLU default
EPS = 1e-5         # nn.BatchNorm3d default


def _leaky(v):
    return jnp.where(v >= 0, v, NEG_SLOPE * v)


# ---------------------------------------------------------------------------
# host-side weight re-layouts (exact: pure 0/1 placement, no matmul rounding)
# ---------------------------------------------------------------------------

def banded_weight(wgt, W):
    """(3,3,3,Ci,Co) -> (9, (W+2)*Ci, W*Co).

    big[kd*3+kh, p*Ci+ci, w*Co+co] = wgt[kd, kh, p-w, ci, co] for 0 <= p-w < 3,
    else 0.  A single matmul of the W-folded, zero-padded activation slab
    against this matrix performs all three kw taps of the 3x3x3 conv at once.
    """
    Ci, Co = wgt.shape[3], wgt.shape[4]
    big = jnp.zeros((3, 3, W + 2, Ci, W, Co), wgt.dtype)
    for kw in range(3):
        for wp in range(W):
            big = big.at[:, :, wp + kw, :, wp, :].set(wgt[:, :, kw])
    return big.reshape(9, (W + 2) * Ci, W * Co)


def blockdiag_weight(wsk, W):
    """(Ci,Co) -> (W*Ci, W*Co): the 1x1x1 conv applied independently at every
    W position of the folded lane axis."""
    return jnp.kron(jnp.eye(W, dtype=wsk.dtype), wsk)


# ---------------------------------------------------------------------------
# Pallas kernels (created per static shape)
# ---------------------------------------------------------------------------

def _make_kernels(D, H, W, Cin, Cout):
    M = D * H   # rows (sublanes) of the folded activation matrix

    def conv1_kernel(x_ref, s0_ref, b0_ref, w1_ref, wsk_ref,
                     h1_ref, hs_ref, hq_ref, ks_ref, kq_ref, pad_ref):
        # x_ref : (1, D, H, W*Cin)        folded input sample
        # s0/b0 : (1, W*Cin)              folded BN0 scale/shift (tiled over W)
        # w1_ref: (9, (W+2)*Cin, W*Cout)  banded conv weight, one slab per (kd,kh)
        # wsk   : (W*Cin, W*Cout)         block-diagonal 1x1x1 skip weight
        # h1_ref: (1, D, H, W*Cout)
        # hs/hq : (1, 1, W*Cout)          per-sample sum / sum-sq of h1
        # ks/kq : (1, 1, W*Cout)          per-sample sum / sum-sq of skip conv
        # pad   : VMEM (D+2, H+2, (W+2)*Cin) zero-padded activation scratch
        x = x_ref[0]
        a0 = _leaky(x * s0_ref[...].reshape(1, 1, W * Cin)
                    + b0_ref[...].reshape(1, 1, W * Cin))

        pad_ref[...] = jnp.zeros_like(pad_ref)
        pad_ref[1:1 + D, 1:1 + H, Cin:Cin + W * Cin] = a0

        xp = pad_ref[...]                                   # (D+2, H+2, (W+2)*Cin)
        acc = jnp.zeros((M, W * Cout), jnp.float32)
        for idx in range(9):                                # 9 matmuls, K=(W+2)*Cin
            kd, kh = idx // 3, idx % 3
            slab = xp[kd:kd + D, kh:kh + H, :].reshape(M, (W + 2) * Cin)
            acc = acc + jnp.dot(slab, w1_ref[idx],
                                preferred_element_type=jnp.float32)

        h1_ref[...] = acc.reshape(1, D, H, W * Cout)
        hs_ref[...] = jnp.sum(acc, axis=0, keepdims=True).reshape(1, 1, W * Cout)
        hq_ref[...] = jnp.sum(acc * acc, axis=0, keepdims=True).reshape(1, 1, W * Cout)

        # skip 1x1x1 conv: computed here only for its batch statistics; it is
        # recomputed (never stored to HBM) in kernel B's epilogue.
        sk = jnp.dot(x.reshape(M, W * Cin), wsk_ref[...],
                     preferred_element_type=jnp.float32)
        ks_ref[...] = jnp.sum(sk, axis=0, keepdims=True).reshape(1, 1, W * Cout)
        kq_ref[...] = jnp.sum(sk * sk, axis=0, keepdims=True).reshape(1, 1, W * Cout)

    def conv2_kernel(h1_ref, x_ref, s1_ref, b1_ref, w2_ref, wsk_ref,
                     s2_ref, b2_ref, o_ref, pad_ref):
        # main branch: BN1 + LeakyReLU prologue, then conv3x3x3 (#2)
        a1 = _leaky(h1_ref[0] * s1_ref[...].reshape(1, 1, W * Cout)
                    + b1_ref[...].reshape(1, 1, W * Cout))

        pad_ref[...] = jnp.zeros_like(pad_ref)
        pad_ref[1:1 + D, 1:1 + H, Cout:Cout + W * Cout] = a1

        xp = pad_ref[...]                                   # (D+2, H+2, (W+2)*Cout)
        acc = jnp.zeros((M, W * Cout), jnp.float32)
        for idx in range(9):
            kd, kh = idx // 3, idx % 3
            slab = xp[kd:kd + D, kh:kh + H, :].reshape(M, (W + 2) * Cout)
            acc = acc + jnp.dot(slab, w2_ref[idx],
                                preferred_element_type=jnp.float32)

        # fused skip epilogue: conv1x1x1 -> BN -> LeakyReLU -> residual add
        sk = jnp.dot(x_ref[0].reshape(M, W * Cin), wsk_ref[...],
                     preferred_element_type=jnp.float32)
        sk = _leaky(sk * s2_ref[...] + b2_ref[...])
        o_ref[...] = (acc + sk).reshape(1, D, H, W * Cout)

    return conv1_kernel, conv2_kernel


# ---------------------------------------------------------------------------
# full forward
# ---------------------------------------------------------------------------

def preact_resblock_down(x_ncdhw, w1, w2, wskip):
    x = jnp.transpose(x_ncdhw, (0, 2, 3, 4, 1))             # NCDHW -> NDHWC
    N, D, H, W, Cin = x.shape
    Cout = w1.shape[-1]
    Mtot = N * D * H * W

    conv1_kernel, conv2_kernel = _make_kernels(D, H, W, Cin, Cout)

    # BN0: batch stats of the raw input (no producing kernel to fuse into;
    # a single fused XLA reduction pass over x).
    mean0 = jnp.mean(x, axis=(0, 1, 2, 3))
    var0 = jnp.mean((x - mean0) ** 2, axis=(0, 1, 2, 3))
    sc0 = 1.0 / jnp.sqrt(var0 + EPS)
    sh0 = -mean0 * sc0
    s0t = jnp.tile(sc0, W).reshape(1, W * Cin)
    b0t = jnp.tile(sh0, W).reshape(1, W * Cin)

    # host-side weight re-layouts (exact)
    w1_b = banded_weight(w1, W)                             # (9,(W+2)*Cin,W*Cout)
    w2_b = banded_weight(w2, W)                             # (9,(W+2)*Cout,W*Cout)
    wsk_b = blockdiag_weight(wskip.reshape(Cin, Cout), W)   # (W*Cin, W*Cout)

    x_f = x.reshape(N, D, H, W * Cin)                       # W folded into lanes

    # ----- kernel A: BN0+Leaky -> conv1, emits h1 + all needed statistics ----
    h1, hs, hq, ks, kq = pl.pallas_call(
        conv1_kernel,
        out_shape=(
            jax.ShapeDtypeStruct((N, D, H, W * Cout), jnp.float32),
            jax.ShapeDtypeStruct((N, 1, W * Cout), jnp.float32),
            jax.ShapeDtypeStruct((N, 1, W * Cout), jnp.float32),
            jax.ShapeDtypeStruct((N, 1, W * Cout), jnp.float32),
            jax.ShapeDtypeStruct((N, 1, W * Cout), jnp.float32),
        ),
        grid=(N,),
        in_specs=[
            pl.BlockSpec((1, D, H, W * Cin), lambda n: (n, 0, 0, 0)),
            pl.BlockSpec((1, W * Cin), lambda n: (0, 0)),
            pl.BlockSpec((1, W * Cin), lambda n: (0, 0)),
            pl.BlockSpec((9, (W + 2) * Cin, W * Cout), lambda n: (0, 0, 0)),
            pl.BlockSpec((W * Cin, W * Cout), lambda n: (0, 0)),
        ],
        out_specs=(
            pl.BlockSpec((1, D, H, W * Cout), lambda n: (n, 0, 0, 0)),
            pl.BlockSpec((1, 1, W * Cout), lambda n: (n, 0, 0)),
            pl.BlockSpec((1, 1, W * Cout), lambda n: (n, 0, 0)),
            pl.BlockSpec((1, 1, W * Cout), lambda n: (n, 0, 0)),
            pl.BlockSpec((1, 1, W * Cout), lambda n: (n, 0, 0)),
        ),
        scratch_shapes=[pltpu.VMEM((D + 2, H + 2, (W + 2) * Cin), jnp.float32)],
        compiler_params=pltpu.CompilerParams(dimension_semantics=("parallel",)),
    )(x_f, s0t, b0t, w1_b, wsk_b)

    # fold BN1 (stats of h1) and BN_skip (stats of the 1x1x1 conv) from the
    # tiny per-sample partial sums (no re-read of the activations).
    def fold_stats(s_part, q_part):
        s = jnp.sum(s_part.reshape(N, W, Cout), axis=(0, 1))
        q = jnp.sum(q_part.reshape(N, W, Cout), axis=(0, 1))
        mean = s / Mtot
        var = q / Mtot - mean * mean
        sc = 1.0 / jnp.sqrt(var + EPS)
        sh = -mean * sc
        return (jnp.tile(sc, W).reshape(1, W * Cout),
                jnp.tile(sh, W).reshape(1, W * Cout))

    s1t, b1t = fold_stats(hs, hq)
    s2t, b2t = fold_stats(ks, kq)

    # ----- kernel B: BN1+Leaky -> conv2, with fused skip epilogue ------------
    out_f = pl.pallas_call(
        conv2_kernel,
        out_shape=jax.ShapeDtypeStruct((N, D, H, W * Cout), jnp.float32),
        grid=(N,),
        in_specs=[
            pl.BlockSpec((1, D, H, W * Cout), lambda n: (n, 0, 0, 0)),
            pl.BlockSpec((1, D, H, W * Cin), lambda n: (n, 0, 0, 0)),
            pl.BlockSpec((1, W * Cout), lambda n: (0, 0)),
            pl.BlockSpec((1, W * Cout), lambda n: (0, 0)),
            pl.BlockSpec((9, (W + 2) * Cout, W * Cout), lambda n: (0, 0, 0)),
            pl.BlockSpec((W * Cin, W * Cout), lambda n: (0, 0)),
            pl.BlockSpec((1, W * Cout), lambda n: (0, 0)),
            pl.BlockSpec((1, W * Cout), lambda n: (0, 0)),
        ],
        out_specs=pl.BlockSpec((1, D, H, W * Cout), lambda n: (n, 0, 0, 0)),
        scratch_shapes=[pltpu.VMEM((D + 2, H + 2, (W + 2) * Cout), jnp.float32)],
        compiler_params=pltpu.CompilerParams(dimension_semantics=("parallel",)),
    )(h1, x_f, s1t, b1t, w2_b, wsk_b, s2t, b2t)

    out = out_f.reshape(N, D, H, W, Cout)
    return jnp.transpose(out, (0, 4, 1, 2, 3))              # NDHWC -> NCDHW


# ---------------------------------------------------------------------------
# parameter init (spectral_norm parameterization applied at init, host side)
# ---------------------------------------------------------------------------

def spectral_normalize(w, n_iter=10):
    wm = w.reshape(w.shape[0], -1)
    v = jnp.ones((wm.shape[1],), jnp.float32) / jnp.sqrt(wm.shape[1])
    for _ in range(n_iter):
        u = wm @ v
        u = u / (jnp.linalg.norm(u) + 1e-12)
        v = wm.T @ u
        v = v / (jnp.linalg.norm(v) + 1e-12)
    sigma = u @ (wm @ v)
    return w / sigma


def init_params(key, c_in, c_out):
    k1, k2, k3 = jax.random.split(key, 3)
    # PyTorch Conv3d weight layout: (Cout, Cin, kD, kH, kW)
    w1 = spectral_normalize(0.1 * jax.random.normal(k1, (c_out, c_in, 3, 3, 3), jnp.float32))
    w2 = spectral_normalize(0.1 * jax.random.normal(k2, (c_out, c_out, 3, 3, 3), jnp.float32))
    ws = spectral_normalize(0.1 * jax.random.normal(k3, (c_out, c_in, 1, 1, 1), jnp.float32))
    to_dhwio = lambda w: jnp.transpose(w, (2, 3, 4, 1, 0))  # -> (kD,kH,kW,Cin,Cout)
    return to_dhwio(w1), to_dhwio(w2), to_dhwio(ws)


# ---------------------------------------------------------------------------
# pure-JAX reference
# ---------------------------------------------------------------------------

def ref_forward(x_ncdhw, w1, w2, wskip):
    x = jnp.transpose(x_ncdhw, (0, 2, 3, 4, 1))

    def bn_leaky_ref(t):
        mean = jnp.mean(t, axis=(0, 1, 2, 3), keepdims=True)
        var = jnp.mean((t - mean) ** 2, axis=(0, 1, 2, 3), keepdims=True)
        y = (t - mean) / jnp.sqrt(var + EPS)
        return jnp.where(y >= 0, y, NEG_SLOPE * y)

    def conv(t, w):
        return jax.lax.conv_general_dilated(
            t, w, (1, 1, 1), "SAME",
            dimension_numbers=("NDHWC", "DHWIO", "NDHWC"))

    h = conv(bn_leaky_ref(x), w1)
    h = conv(bn_leaky_ref(h), w2)
    s = bn_leaky_ref(conv(x, wskip))
    return jnp.transpose(h + s, (0, 4, 1, 2, 3))


# ---------------------------------------------------------------------------

if __name__ == "__main__":
    N, C_IN, C_OUT, D, H, W = 2, 4, 8, 8, 8, 8
    key = jax.random.PRNGKey(0)
    kx, kp = jax.random.split(key)
    x = jax.random.normal(kx, (N, C_IN, D, H, W), jnp.float32)
    w1, w2, wskip = init_params(kp, C_IN, C_OUT)

    out = jax.jit(preact_resblock_down)(x, w1, w2, wskip)
    out = jax.block_until_ready(out)

    ref = ref_forward(x, w1, w2, wskip)
    assert out.shape == (N, C_OUT, D, H, W), out.shape
    err = float(jnp.max(jnp.abs(out - ref)))
    assert jnp.allclose(out, ref, atol=2e-4, rtol=2e-4), err

    print("KERNEL_OK")
</pallas_src>

<mosaic_0001>
module attributes {stable_mosaic.version = 11 : i64} {
  func.func @conv1_kernel(%arg0: i32, %arg1: memref<1x8x8x32xf32, #tpu.memory_space<vmem>>, %arg2: memref<1x32xf32, #tpu.memory_space<vmem>>, %arg3: memref<1x32xf32, #tpu.memory_space<vmem>>, %arg4: memref<9x40x64xf32, #tpu.memory_space<vmem>>, %arg5: memref<32x64xf32, #tpu.memory_space<vmem>>, %arg6: memref<1x8x8x64xf32, #tpu.memory_space<vmem>>, %arg7: memref<1x1x64xf32, #tpu.memory_space<vmem>>, %arg8: memref<1x1x64xf32, #tpu.memory_space<vmem>>, %arg9: memref<1x1x64xf32, #tpu.memory_space<vmem>>, %arg10: memref<1x1x64xf32, #tpu.memory_space<vmem>>, %arg11: memref<10x10x40xf32, #tpu.memory_space<vmem>>) attributes {dimension_semantics = [#tpu.dimension_semantics<parallel>], iteration_bounds = array<i64: 2>, scalar_prefetch = 0 : i64, scratch_operands = 1 : i64, tpu.core_type = #tpu.core_type<tc>, window_params = [{transform_indices = @transform_0, window_bounds = array<i64: 1, 8, 8, 32>}, {pipeline_mode = #tpu.pipeline_mode<synchronous>, transform_indices = @transform_1, window_bounds = array<i64: 1, 32>}, {pipeline_mode = #tpu.pipeline_mode<synchronous>, transform_indices = @transform_2, window_bounds = array<i64: 1, 32>}, {pipeline_mode = #tpu.pipeline_mode<synchronous>, transform_indices = @transform_3, window_bounds = array<i64: 9, 40, 64>}, {pipeline_mode = #tpu.pipeline_mode<synchronous>, transform_indices = @transform_4, window_bounds = array<i64: 32, 64>}, {transform_indices = @transform_5, window_bounds = array<i64: 1, 8, 8, 64>}, {transform_indices = @transform_6, window_bounds = array<i64: 1, 1, 64>}, {transform_indices = @transform_7, window_bounds = array<i64: 1, 1, 64>}, {transform_indices = @transform_8, window_bounds = array<i64: 1, 1, 64>}, {transform_indices = @transform_9, window_bounds = array<i64: 1, 1, 64>}]} {
    %c0 = arith.constant 0 : index
    %c0_0 = arith.constant 0 : index
    %c0_1 = arith.constant 0 : index
    %c0_2 = arith.constant 0 : index
    %0 = vector.load %arg1[%c0, %c0_0, %c0_1, %c0_2] : memref<1x8x8x32xf32, #tpu.memory_space<vmem>>, vector<1x8x8x32xf32>
    %1 = vector.shape_cast %0 : vector<1x8x8x32xf32> to vector<8x8x32xf32>
    %c0_3 = arith.constant 0 : index
    %c0_4 = arith.constant 0 : index
    %2 = vector.load %arg2[%c0_3, %c0_4] : memref<1x32xf32, #tpu.memory_space<vmem>>, vector<1x32xf32>
    %3 = vector.shape_cast %2 : vector<1x32xf32> to vector<1x1x32xf32>
    %4 = vector.broadcast %3 : vector<1x1x32xf32> to vector<8x8x32xf32>
    %5 = arith.mulf %1, %4 : vector<8x8x32xf32>
    %c0_5 = arith.constant 0 : index
    %c0_6 = arith.constant 0 : index
    %6 = vector.load %arg3[%c0_5, %c0_6] : memref<1x32xf32, #tpu.memory_space<vmem>>, vector<1x32xf32>
    %7 = vector.shape_cast %6 : vector<1x32xf32> to vector<1x1x32xf32>
    %8 = vector.broadcast %7 : vector<1x1x32xf32> to vector<8x8x32xf32>
    %9 = arith.addf %5, %8 : vector<8x8x32xf32>
    %cst = arith.constant 0.000000e+00 : f32
    %10 = vector.broadcast %cst : f32 to vector<8x8x32xf32>
    %11 = arith.cmpf oge, %9, %10 : vector<8x8x32xf32>
    %cst_7 = arith.constant 0.00999999977 : f32
    %12 = vector.broadcast %cst_7 : f32 to vector<8x8x32xf32>
    %13 = arith.mulf %12, %9 : vector<8x8x32xf32>
    %14 = arith.select %11, %9, %13 : vector<8x8x32xi1>, vector<8x8x32xf32>
    %cst_8 = arith.constant 0.000000e+00 : f32
    %15 = vector.broadcast %cst_8 : f32 to vector<10x10x40xf32>
    %c0_9 = arith.constant 0 : index
    %c0_10 = arith.constant 0 : index
    %c0_11 = arith.constant 0 : index
    %16 = vector.load %arg11[%c0_9, %c0_10, %c0_11] : memref<10x10x40xf32, #tpu.memory_space<vmem>>, vector<10x10x40xf32>
    tpu.vector_store %arg11[%c0_9, %c0_10, %c0_11], %15 {strides = array<i32>} : memref<10x10x40xf32, #tpu.memory_space<vmem>>, vector<10x10x40xf32>,
    %c1 = arith.constant 1 : index
    %c1_12 = arith.constant 1 : index
    %c4 = arith.constant 4 : index
    %17 = vector.load %arg11[%c1, %c1_12, %c4] : memref<10x10x40xf32, #tpu.memory_space<vmem>>, vector<8x8x32xf32>
    tpu.vector_store %arg11[%c1, %c1_12, %c4], %14 {strides = array<i32>} : memref<10x10x40xf32, #tpu.memory_space<vmem>>, vector<8x8x32xf32>,
    %c0_13 = arith.constant 0 : index
    %c0_14 = arith.constant 0 : index
    %c0_15 = arith.constant 0 : index
    %18 = vector.load %arg11[%c0_13, %c0_14, %c0_15] : memref<10x10x40xf32, #tpu.memory_space<vmem>>, vector<10x10x40xf32>
    %cst_16 = arith.constant 0.000000e+00 : f32
    %19 = vector.broadcast %cst_16 : f32 to vector<64x64xf32>
    %20 = vector.extract_strided_slice %18 {offsets = [0, 0, 0], sizes = [8, 8, 40], strides = [1, 1, 1]} : vector<10x10x40xf32> to vector<8x8x40xf32>
    %21 = vector.shape_cast %20 : vector<8x8x40xf32> to vector<64x40xf32>
    %c0_17 = arith.constant 0 : index
    %c0_18 = arith.constant 0 : index
    %c0_19 = arith.constant 0 : index
    %22 = vector.load %arg4[%c0_17, %c0_18, %c0_19] : memref<9x40x64xf32, #tpu.memory_space<vmem>>, vector<1x40x64xf32>
    %23 = vector.shape_cast %22 : vector<1x40x64xf32> to vector<40x64xf32>
    %cst_20 = arith.constant dense<0.000000e+00> : vector<64x64xf32>
    %24 = tpu.matmul %21, %23, %cst_20 {dimension_numbers = #tpu.dot_dimension_numbers<[1], [0], [0], [1], [0, 0, 1, 1], [], []>} : vector<64x40xf32>, vector<40x64xf32>, vector<64x64xf32> -> vector<64x64xf32>
    %25 = arith.addf %19, %24 : vector<64x64xf32>
    %26 = vector.extract_strided_slice %18 {offsets = [0, 1, 0], sizes = [8, 8, 40], strides = [1, 1, 1]} : vector<10x10x40xf32> to vector<8x8x40xf32>
    %27 = vector.shape_cast %26 : vector<8x8x40xf32> to vector<64x40xf32>
    %c1_21 = arith.constant 1 : index
    %c0_22 = arith.constant 0 : index
    %c0_23 = arith.constant 0 : index
    %28 = vector.load %arg4[%c1_21, %c0_22, %c0_23] : memref<9x40x64xf32, #tpu.memory_space<vmem>>, vector<1x40x64xf32>
    %29 = vector.shape_cast %28 : vector<1x40x64xf32> to vector<40x64xf32>
    %cst_24 = arith.constant dense<0.000000e+00> : vector<64x64xf32>
    %30 = tpu.matmul %27, %29, %cst_24 {dimension_numbers = #tpu.dot_dimension_numbers<[1], [0], [0], [1], [0, 0, 1, 1], [], []>} : vector<64x40xf32>, vector<40x64xf32>, vector<64x64xf32> -> vector<64x64xf32>
    %31 = arith.addf %25, %30 : vector<64x64xf32>
    %32 = vector.extract_strided_slice %18 {offsets = [0, 2, 0], sizes = [8, 8, 40], strides = [1, 1, 1]} : vector<10x10x40xf32> to vector<8x8x40xf32>
    %33 = vector.shape_cast %32 : vector<8x8x40xf32> to vector<64x40xf32>
    %c2 = arith.constant 2 : index
    %c0_25 = arith.constant 0 : index
    %c0_26 = arith.constant 0 : index
    %34 = vector.load %arg4[%c2, %c0_25, %c0_26] : memref<9x40x64xf32, #tpu.memory_space<vmem>>, vector<1x40x64xf32>
    %35 = vector.shape_cast %34 : vector<1x40x64xf32> to vector<40x64xf32>
    %cst_27 = arith.constant dense<0.000000e+00> : vector<64x64xf32>
    %36 = tpu.matmul %33, %35, %cst_27 {dimension_numbers = #tpu.dot_dimension_numbers<[1], [0], [0], [1], [0, 0, 1, 1], [], []>} : vector<64x40xf32>, vector<40x64xf32>, vector<64x64xf32> -> vector<64x64xf32>
    %37 = arith.addf %31, %36 : vector<64x64xf32>
    %38 = vector.extract_strided_slice %18 {offsets = [1, 0, 0], sizes = [8, 8, 40], strides = [1, 1, 1]} : vector<10x10x40xf32> to vector<8x8x40xf32>
    %39 = vector.shape_cast %38 : vector<8x8x40xf32> to vector<64x40xf32>
    %c3 = arith.constant 3 : index
    %c0_28 = arith.constant 0 : index
    %c0_29 = arith.constant 0 : index
    %40 = vector.load %arg4[%c3, %c0_28, %c0_29] : memref<9x40x64xf32, #tpu.memory_space<vmem>>, vector<1x40x64xf32>
    %41 = vector.shape_cast %40 : vector<1x40x64xf32> to vector<40x64xf32>
    %cst_30 = arith.constant dense<0.000000e+00> : vector<64x64xf32>
    %42 = tpu.matmul %39, %41, %cst_30 {dimension_numbers = #tpu.dot_dimension_numbers<[1], [0], [0], [1], [0, 0, 1, 1], [], []>} : vector<64x40xf32>, vector<40x64xf32>, vector<64x64xf32> -> vector<64x64xf32>
    %43 = arith.addf %37, %42 : vector<64x64xf32>
    %44 = vector.extract_strided_slice %18 {offsets = [1, 1, 0], sizes = [8, 8, 40], strides = [1, 1, 1]} : vector<10x10x40xf32> to vector<8x8x40xf32>
    %45 = vector.shape_cast %44 : vector<8x8x40xf32> to vector<64x40xf32>
    %c4_31 = arith.constant 4 : index
    %c0_32 = arith.constant 0 : index
    %c0_33 = arith.constant 0 : index
    %46 = vector.load %arg4[%c4_31, %c0_32, %c0_33] : memref<9x40x64xf32, #tpu.memory_space<vmem>>, vector<1x40x64xf32>
    %47 = vector.shape_cast %46 : vector<1x40x64xf32> to vector<40x64xf32>
    %cst_34 = arith.constant dense<0.000000e+00> : vector<64x64xf32>
    %48 = tpu.matmul %45, %47, %cst_34 {dimension_numbers = #tpu.dot_dimension_numbers<[1], [0], [0], [1], [0, 0, 1, 1], [], []>} : vector<64x40xf32>, vector<40x64xf32>, vector<64x64xf32> -> vector<64x64xf32>
    %49 = arith.addf %43, %48 : vector<64x64xf32>
    %50 = vector.extract_strided_slice %18 {offsets = [1, 2, 0], sizes = [8, 8, 40], strides = [1, 1, 1]} : vector<10x10x40xf32> to vector<8x8x40xf32>
    %51 = vector.shape_cast %50 : vector<8x8x40xf32> to vector<64x40xf32>
    %c5 = arith.constant 5 : index
    %c0_35 = arith.constant 0 : index
    %c0_36 = arith.constant 0 : index
    %52 = vector.load %arg4[%c5, %c0_35, %c0_36] : memref<9x40x64xf32, #tpu.memory_space<vmem>>, vector<1x40x64xf32>
    %53 = vector.shape_cast %52 : vector<1x40x64xf32> to vector<40x64xf32>
    %cst_37 = arith.constant dense<0.000000e+00> : vector<64x64xf32>
    %54 = tpu.matmul %51, %53, %cst_37 {dimension_numbers = #tpu.dot_dimension_numbers<[1], [0], [0], [1], [0, 0, 1, 1], [], []>} : vector<64x40xf32>, vector<40x64xf32>, vector<64x64xf32> -> vector<64x64xf32>
    %55 = arith.addf %49, %54 : vector<64x64xf32>
    %56 = vector.extract_strided_slice %18 {offsets = [2, 0, 0], sizes = [8, 8, 40], strides = [1, 1, 1]} : vector<10x10x40xf32> to vector<8x8x40xf32>
    %57 = vector.shape_cast %56 : vector<8x8x40xf32> to vector<64x40xf32>
    %c6 = arith.constant 6 : index
    %c0_38 = arith.constant 0 : index
    %c0_39 = arith.constant 0 : index
    %58 = vector.load %arg4[%c6, %c0_38, %c0_39] : memref<9x40x64xf32, #tpu.memory_space<vmem>>, vector<1x40x64xf32>
    %59 = vector.shape_cast %58 : vector<1x40x64xf32> to vector<40x64xf32>
    %cst_40 = arith.constant dense<0.000000e+00> : vector<64x64xf32>
    %60 = tpu.matmul %57, %59, %cst_40 {dimension_numbers = #tpu.dot_dimension_numbers<[1], [0], [0], [1], [0, 0, 1, 1], [], []>} : vector<64x40xf32>, vector<40x64xf32>, vector<64x64xf32> -> vector<64x64xf32>
    %61 = arith.addf %55, %60 : vector<64x64xf32>
    %62 = vector.extract_strided_slice %18 {offsets = [2, 1, 0], sizes = [8, 8, 40], strides = [1, 1, 1]} : vector<10x10x40xf32> to vector<8x8x40xf32>
    %63 = vector.shape_cast %62 : vector<8x8x40xf32> to vector<64x40xf32>
    %c7 = arith.constant 7 : index
    %c0_41 = arith.constant 0 : index
    %c0_42 = arith.constant 0 : index
    %64 = vector.load %arg4[%c7, %c0_41, %c0_42] : memref<9x40x64xf32, #tpu.memory_space<vmem>>, vector<1x40x64xf32>
    %65 = vector.shape_cast %64 : vector<1x40x64xf32> to vector<40x64xf32>
    %cst_43 = arith.constant dense<0.000000e+00> : vector<64x64xf32>
    %66 = tpu.matmul %63, %65, %cst_43 {dimension_numbers = #tpu.dot_dimension_numbers<[1], [0], [0], [1], [0, 0, 1, 1], [], []>} : vector<64x40xf32>, vector<40x64xf32>, vector<64x64xf32> -> vector<64x64xf32>
    %67 = arith.addf %61, %66 : vector<64x64xf32>
    %68 = vector.extract_strided_slice %18 {offsets = [2, 2, 0], sizes = [8, 8, 40], strides = [1, 1, 1]} : vector<10x10x40xf32> to vector<8x8x40xf32>
    %69 = vector.shape_cast %68 : vector<8x8x40xf32> to vector<64x40xf32>
    %c8 = arith.constant 8 : index
    %c0_44 = arith.constant 0 : index
    %c0_45 = arith.constant 0 : index
    %70 = vector.load %arg4[%c8, %c0_44, %c0_45] : memref<9x40x64xf32, #tpu.memory_space<vmem>>, vector<1x40x64xf32>
    %71 = vector.shape_cast %70 : vector<1x40x64xf32> to vector<40x64xf32>
    %cst_46 = arith.constant dense<0.000000e+00> : vector<64x64xf32>
    %72 = tpu.matmul %69, %71, %cst_46 {dimension_numbers = #tpu.dot_dimension_numbers<[1], [0], [0], [1], [0, 0, 1, 1], [], []>} : vector<64x40xf32>, vector<40x64xf32>, vector<64x64xf32> -> vector<64x64xf32>
    %73 = arith.addf %67, %72 : vector<64x64xf32>
    %74 = vector.shape_cast %73 : vector<64x64xf32> to vector<1x8x8x64xf32>
    %c0_47 = arith.constant 0 : index
    %c0_48 = arith.constant 0 : index
    %c0_49 = arith.constant 0 : index
    %c0_50 = arith.constant 0 : index
    %75 = vector.load %arg6[%c0_47, %c0_48, %c0_49, %c0_50] : memref<1x8x8x64xf32, #tpu.memory_space<vmem>>, vector<1x8x8x64xf32>
    tpu.vector_store %arg6[%c0_47, %c0_48, %c0_49, %c0_50], %74 {strides = array<i32>} : memref<1x8x8x64xf32, #tpu.memory_space<vmem>>, vector<1x8x8x64xf32>,
    %cst_51 = arith.constant dense<0.000000e+00> : vector<64xf32>
    %76 = vector.multi_reduction <add>, %73, %cst_51 [0] : vector<64x64xf32> to vector<64xf32>
    %77 = vector.shape_cast %76 : vector<64xf32> to vector<1x64xf32>
    %78 = vector.shape_cast %77 : vector<1x64xf32> to vector<1x1x64xf32>
    %c0_52 = arith.constant 0 : index
    %c0_53 = arith.constant 0 : index
    %c0_54 = arith.constant 0 : index
    %79 = vector.load %arg7[%c0_52, %c0_53, %c0_54] : memref<1x1x64xf32, #tpu.memory_space<vmem>>, vector<1x1x64xf32>
    tpu.vector_store %arg7[%c0_52, %c0_53, %c0_54], %78 {strides = array<i32>} : memref<1x1x64xf32, #tpu.memory_space<vmem>>, vector<1x1x64xf32>,
    %80 = arith.mulf %73, %73 : vector<64x64xf32>
    %cst_55 = arith.constant dense<0.000000e+00> : vector<64xf32>
    %81 = vector.multi_reduction <add>, %80, %cst_55 [0] : vector<64x64xf32> to vector<64xf32>
    %82 = vector.shape_cast %81 : vector<64xf32> to vector<1x64xf32>
    %83 = vector.shape_cast %82 : vector<1x64xf32> to vector<1x1x64xf32>
    %c0_56 = arith.constant 0 : index
    %c0_57 = arith.constant 0 : index
    %c0_58 = arith.constant 0 : index
    %84 = vector.load %arg8[%c0_56, %c0_57, %c0_58] : memref<1x1x64xf32, #tpu.memory_space<vmem>>, vector<1x1x64xf32>
    tpu.vector_store %arg8[%c0_56, %c0_57, %c0_58], %83 {strides = array<i32>} : memref<1x1x64xf32, #tpu.memory_space<vmem>>, vector<1x1x64xf32>,
    %85 = vector.shape_cast %1 : vector<8x8x32xf32> to vector<64x32xf32>
    %c0_59 = arith.constant 0 : index
    %c0_60 = arith.constant 0 : index
    %86 = vector.load %arg5[%c0_59, %c0_60] : memref<32x64xf32, #tpu.memory_space<vmem>>, vector<32x64xf32>
    %cst_61 = arith.constant dense<0.000000e+00> : vector<64x64xf32>
    %87 = tpu.matmul %85, %86, %cst_61 {dimension_numbers = #tpu.dot_dimension_numbers<[1], [0], [0], [1], [0, 0, 1, 1], [], []>} : vector<64x32xf32>, vector<32x64xf32>, vector<64x64xf32> -> vector<64x64xf32>
    %cst_62 = arith.constant dense<0.000000e+00> : vector<64xf32>
    %88 = vector.multi_reduction <add>, %87, %cst_62 [0] : vector<64x64xf32> to vector<64xf32>
    %89 = vector.shape_cast %88 : vector<64xf32> to vector<1x64xf32>
    %90 = vector.shape_cast %89 : vector<1x64xf32> to vector<1x1x64xf32>
    %c0_63 = arith.constant 0 : index
    %c0_64 = arith.constant 0 : index
    %c0_65 = arith.constant 0 : index
    %91 = vector.load %arg9[%c0_63, %c0_64, %c0_65] : memref<1x1x64xf32, #tpu.memory_space<vmem>>, vector<1x1x64xf32>
    tpu.vector_store %arg9[%c0_63, %c0_64, %c0_65], %90 {strides = array<i32>} : memref<1x1x64xf32, #tpu.memory_space<vmem>>, vector<1x1x64xf32>,
    %92 = arith.mulf %87, %87 : vector<64x64xf32>
    %cst_66 = arith.constant dense<0.000000e+00> : vector<64xf32>
    %93 = vector.multi_reduction <add>, %92, %cst_66 [0] : vector<64x64xf32> to vector<64xf32>
    %94 = vector.shape_cast %93 : vector<64xf32> to vector<1x64xf32>
    %95 = vector.shape_cast %94 : vector<1x64xf32> to vector<1x1x64xf32>
    %c0_67 = arith.constant 0 : index
    %c0_68 = arith.constant 0 : index
    %c0_69 = arith.constant 0 : index
    %96 = vector.load %arg10[%c0_67, %c0_68, %c0_69] : memref<1x1x64xf32, #tpu.memory_space<vmem>>, vector<1x1x64xf32>
    tpu.vector_store %arg10[%c0_67, %c0_68, %c0_69], %95 {strides = array<i32>} : memref<1x1x64xf32, #tpu.memory_space<vmem>>, vector<1x1x64xf32>,
    return
  }
  func.func @transform_0(%arg0: i32) -> (i32, i32, i32, i32) {
    %c0_i32 = arith.constant 0 : i32
    %c0_i32_0 = arith.constant 0 : i32
    %c0_i32_1 = arith.constant 0 : i32
    %c0_i32_2 = arith.constant 0 : i32
    return %arg0, %c0_i32, %c0_i32_0, %c0_i32_1 : i32, i32, i32, i32
  }
  func.func @transform_1(%arg0: i32) -> (i32, i32) {
    %c0_i32 = arith.constant 0 : i32
    %c0_i32_0 = arith.constant 0 : i32
    %c0_i32_1 = arith.constant 0 : i32
    return %c0_i32, %c0_i32_0 : i32, i32
  }
  func.func @transform_2(%arg0: i32) -> (i32, i32) {
    %c0_i32 = arith.constant 0 : i32
    %c0_i32_0 = arith.constant 0 : i32
    %c0_i32_1 = arith.constant 0 : i32
    return %c0_i32, %c0_i32_0 : i32, i32
  }
  func.func @transform_3(%arg0: i32) -> (i32, i32, i32) {
    %c0_i32 = arith.constant 0 : i32
    %c0_i32_0 = arith.constant 0 : i32
    %c0_i32_1 = arith.constant 0 : i32
    %c0_i32_2 = arith.constant 0 : i32
    return %c0_i32, %c0_i32_0, %c0_i32_1 : i32, i32, i32
  }
  func.func @transform_4(%arg0: i32) -> (i32, i32) {
    %c0_i32 = arith.constant 0 : i32
    %c0_i32_0 = arith.constant 0 : i32
    %c0_i32_1 = arith.constant 0 : i32
    return %c0_i32, %c0_i32_0 : i32, i32
  }
  func.func @transform_5(%arg0: i32) -> (i32, i32, i32, i32) {
    %c0_i32 = arith.constant 0 : i32
    %c0_i32_0 = arith.constant 0 : i32
    %c0_i32_1 = arith.constant 0 : i32
    %c0_i32_2 = arith.constant 0 : i32
    return %arg0, %c0_i32, %c0_i32_0, %c0_i32_1 : i32, i32, i32, i32
  }
  func.func @transform_6(%arg0: i32) -> (i32, i32, i32) {
    %c0_i32 = arith.constant 0 : i32
    %c0_i32_0 = arith.constant 0 : i32
    %c0_i32_1 = arith.constant 0 : i32
    return %arg0, %c0_i32, %c0_i32_0 : i32, i32, i32
  }
  func.func @transform_7(%arg0: i32) -> (i32, i32, i32) {
    %c0_i32 = arith.constant 0 : i32
    %c0_i32_0 = arith.constant 0 : i32
    %c0_i32_1 = arith.constant 0 : i32
    return %arg0, %c0_i32, %c0_i32_0 : i32, i32, i32
  }
  func.func @transform_8(%arg0: i32) -> (i32, i32, i32) {
    %c0_i32 = arith.constant 0 : i32
    %c0_i32_0 = arith.constant 0 : i32
    %c0_i32_1 = arith.constant 0 : i32
    return %arg0, %c0_i32, %c0_i32_0 : i32, i32, i32
  }
  func.func @transform_9(%arg0: i32) -> (i32, i32, i32) {
    %c0_i32 = arith.constant 0 : i32
    %c0_i32_0 = arith.constant 0 : i32
    %c0_i32_1 = arith.constant 0 : i32
    return %arg0, %c0_i32, %c0_i32_0 : i32, i32, i32
  }
}

module attributes {stable_mosaic.version = 11 : i64} {
  func.func @conv2_kernel(%arg0: i32, %arg1: memref<1x8x8x64xf32, #tpu.memory_space<vmem>>, %arg2: memref<1x8x8x32xf32, #tpu.memory_space<vmem>>, %arg3: memref<1x64xf32, #tpu.memory_space<vmem>>, %arg4: memref<1x64xf32, #tpu.memory_space<vmem>>, %arg5: memref<9x80x64xf32, #tpu.memory_space<vmem>>, %arg6: memref<32x64xf32, #tpu.memory_space<vmem>>, %arg7: memref<1x64xf32, #tpu.memory_space<vmem>>, %arg8: memref<1x64xf32, #tpu.memory_space<vmem>>, %arg9: memref<1x8x8x64xf32, #tpu.memory_space<vmem>>, %arg10: memref<10x10x80xf32, #tpu.memory_space<vmem>>) attributes {dimension_semantics = [#tpu.dimension_semantics<parallel>], iteration_bounds = array<i64: 2>, scalar_prefetch = 0 : i64, scratch_operands = 1 : i64, tpu.core_type = #tpu.core_type<tc>, window_params = [{transform_indices = @transform_0, window_bounds = array<i64: 1, 8, 8, 64>}, {transform_indices = @transform_1, window_bounds = array<i64: 1, 8, 8, 32>}, {pipeline_mode = #tpu.pipeline_mode<synchronous>, transform_indices = @transform_2, window_bounds = array<i64: 1, 64>}, {pipeline_mode = #tpu.pipeline_mode<synchronous>, transform_indices = @transform_3, window_bounds = array<i64: 1, 64>}, {pipeline_mode = #tpu.pipeline_mode<synchronous>, transform_indices = @transform_4, window_bounds = array<i64: 9, 80, 64>}, {pipeline_mode = #tpu.pipeline_mode<synchronous>, transform_indices = @transform_5, window_bounds = array<i64: 32, 64>}, {pipeline_mode = #tpu.pipeline_mode<synchronous>, transform_indices = @transform_6, window_bounds = array<i64: 1, 64>}, {pipeline_mode = #tpu.pipeline_mode<synchronous>, transform_indices = @transform_7, window_bounds = array<i64: 1, 64>}, {transform_indices = @transform_8, window_bounds = array<i64: 1, 8, 8, 64>}]} {
    %c0 = arith.constant 0 : index
    %c0_0 = arith.constant 0 : index
    %c0_1 = arith.constant 0 : index
    %c0_2 = arith.constant 0 : index
    %0 = vector.load %arg1[%c0, %c0_0, %c0_1, %c0_2] : memref<1x8x8x64xf32, #tpu.memory_space<vmem>>, vector<1x8x8x64xf32>
    %1 = vector.shape_cast %0 : vector<1x8x8x64xf32> to vector<8x8x64xf32>
    %c0_3 = arith.constant 0 : index
    %c0_4 = arith.constant 0 : index
    %2 = vector.load %arg3[%c0_3, %c0_4] : memref<1x64xf32, #tpu.memory_space<vmem>>, vector<1x64xf32>
    %3 = vector.shape_cast %2 : vector<1x64xf32> to vector<1x1x64xf32>
    %4 = vector.broadcast %3 : vector<1x1x64xf32> to vector<8x8x64xf32>
    %5 = arith.mulf %1, %4 : vector<8x8x64xf32>
    %c0_5 = arith.constant 0 : index
    %c0_6 = arith.constant 0 : index
    %6 = vector.load %arg4[%c0_5, %c0_6] : memref<1x64xf32, #tpu.memory_space<vmem>>, vector<1x64xf32>
    %7 = vector.shape_cast %6 : vector<1x64xf32> to vector<1x1x64xf32>
    %8 = vector.broadcast %7 : vector<1x1x64xf32> to vector<8x8x64xf32>
    %9 = arith.addf %5, %8 : vector<8x8x64xf32>
    %cst = arith.constant 0.000000e+00 : f32
    %10 = vector.broadcast %cst : f32 to vector<8x8x64xf32>
    %11 = arith.cmpf oge, %9, %10 : vector<8x8x64xf32>
    %cst_7 = arith.constant 0.00999999977 : f32
    %12 = vector.broadcast %cst_7 : f32 to vector<8x8x64xf32>
    %13 = arith.mulf %12, %9 : vector<8x8x64xf32>
    %14 = arith.select %11, %9, %13 : vector<8x8x64xi1>, vector<8x8x64xf32>
    %cst_8 = arith.constant 0.000000e+00 : f32
    %15 = vector.broadcast %cst_8 : f32 to vector<10x10x80xf32>
    %c0_9 = arith.constant 0 : index
    %c0_10 = arith.constant 0 : index
    %c0_11 = arith.constant 0 : index
    %16 = vector.load %arg10[%c0_9, %c0_10, %c0_11] : memref<10x10x80xf32, #tpu.memory_space<vmem>>, vector<10x10x80xf32>
    tpu.vector_store %arg10[%c0_9, %c0_10, %c0_11], %15 {strides = array<i32>} : memref<10x10x80xf32, #tpu.memory_space<vmem>>, vector<10x10x80xf32>,
    %c1 = arith.constant 1 : index
    %c1_12 = arith.constant 1 : index
    %c8 = arith.constant 8 : index
    %17 = vector.load %arg10[%c1, %c1_12, %c8] : memref<10x10x80xf32, #tpu.memory_space<vmem>>, vector<8x8x64xf32>
    tpu.vector_store %arg10[%c1, %c1_12, %c8], %14 {strides = array<i32>} : memref<10x10x80xf32, #tpu.memory_space<vmem>>, vector<8x8x64xf32>,
    %c0_13 = arith.constant 0 : index
    %c0_14 = arith.constant 0 : index
    %c0_15 = arith.constant 0 : index
    %18 = vector.load %arg10[%c0_13, %c0_14, %c0_15] : memref<10x10x80xf32, #tpu.memory_space<vmem>>, vector<10x10x80xf32>
    %cst_16 = arith.constant 0.000000e+00 : f32
    %19 = vector.broadcast %cst_16 : f32 to vector<64x64xf32>
    %20 = vector.extract_strided_slice %18 {offsets = [0, 0, 0], sizes = [8, 8, 80], strides = [1, 1, 1]} : vector<10x10x80xf32> to vector<8x8x80xf32>
    %21 = vector.shape_cast %20 : vector<8x8x80xf32> to vector<64x80xf32>
    %c0_17 = arith.constant 0 : index
    %c0_18 = arith.constant 0 : index
    %c0_19 = arith.constant 0 : index
    %22 = vector.load %arg5[%c0_17, %c0_18, %c0_19] : memref<9x80x64xf32, #tpu.memory_space<vmem>>, vector<1x80x64xf32>
    %23 = vector.shape_cast %22 : vector<1x80x64xf32> to vector<80x64xf32>
    %cst_20 = arith.constant dense<0.000000e+00> : vector<64x64xf32>
    %24 = tpu.matmul %21, %23, %cst_20 {dimension_numbers = #tpu.dot_dimension_numbers<[1], [0], [0], [1], [0, 0, 1, 1], [], []>} : vector<64x80xf32>, vector<80x64xf32>, vector<64x64xf32> -> vector<64x64xf32>
    %25 = arith.addf %19, %24 : vector<64x64xf32>
    %26 = vector.extract_strided_slice %18 {offsets = [0, 1, 0], sizes = [8, 8, 80], strides = [1, 1, 1]} : vector<10x10x80xf32> to vector<8x8x80xf32>
    %27 = vector.shape_cast %26 : vector<8x8x80xf32> to vector<64x80xf32>
    %c1_21 = arith.constant 1 : index
    %c0_22 = arith.constant 0 : index
    %c0_23 = arith.constant 0 : index
    %28 = vector.load %arg5[%c1_21, %c0_22, %c0_23] : memref<9x80x64xf32, #tpu.memory_space<vmem>>, vector<1x80x64xf32>
    %29 = vector.shape_cast %28 : vector<1x80x64xf32> to vector<80x64xf32>
    %cst_24 = arith.constant dense<0.000000e+00> : vector<64x64xf32>
    %30 = tpu.matmul %27, %29, %cst_24 {dimension_numbers = #tpu.dot_dimension_numbers<[1], [0], [0], [1], [0, 0, 1, 1], [], []>} : vector<64x80xf32>, vector<80x64xf32>, vector<64x64xf32> -> vector<64x64xf32>
    %31 = arith.addf %25, %30 : vector<64x64xf32>
    %32 = vector.extract_strided_slice %18 {offsets = [0, 2, 0], sizes = [8, 8, 80], strides = [1, 1, 1]} : vector<10x10x80xf32> to vector<8x8x80xf32>
    %33 = vector.shape_cast %32 : vector<8x8x80xf32> to vector<64x80xf32>
    %c2 = arith.constant 2 : index
    %c0_25 = arith.constant 0 : index
    %c0_26 = arith.constant 0 : index
    %34 = vector.load %arg5[%c2, %c0_25, %c0_26] : memref<9x80x64xf32, #tpu.memory_space<vmem>>, vector<1x80x64xf32>
    %35 = vector.shape_cast %34 : vector<1x80x64xf32> to vector<80x64xf32>
    %cst_27 = arith.constant dense<0.000000e+00> : vector<64x64xf32>
    %36 = tpu.matmul %33, %35, %cst_27 {dimension_numbers = #tpu.dot_dimension_numbers<[1], [0], [0], [1], [0, 0, 1, 1], [], []>} : vector<64x80xf32>, vector<80x64xf32>, vector<64x64xf32> -> vector<64x64xf32>
    %37 = arith.addf %31, %36 : vector<64x64xf32>
    %38 = vector.extract_strided_slice %18 {offsets = [1, 0, 0], sizes = [8, 8, 80], strides = [1, 1, 1]} : vector<10x10x80xf32> to vector<8x8x80xf32>
    %39 = vector.shape_cast %38 : vector<8x8x80xf32> to vector<64x80xf32>
    %c3 = arith.constant 3 : index
    %c0_28 = arith.constant 0 : index
    %c0_29 = arith.constant 0 : index
    %40 = vector.load %arg5[%c3, %c0_28, %c0_29] : memref<9x80x64xf32, #tpu.memory_space<vmem>>, vector<1x80x64xf32>
    %41 = vector.shape_cast %40 : vector<1x80x64xf32> to vector<80x64xf32>
    %cst_30 = arith.constant dense<0.000000e+00> : vector<64x64xf32>
    %42 = tpu.matmul %39, %41, %cst_30 {dimension_numbers = #tpu.dot_dimension_numbers<[1], [0], [0], [1], [0, 0, 1, 1], [], []>} : vector<64x80xf32>, vector<80x64xf32>, vector<64x64xf32> -> vector<64x64xf32>
    %43 = arith.addf %37, %42 : vector<64x64xf32>
    %44 = vector.extract_strided_slice %18 {offsets = [1, 1, 0], sizes = [8, 8, 80], strides = [1, 1, 1]} : vector<10x10x80xf32> to vector<8x8x80xf32>
    %45 = vector.shape_cast %44 : vector<8x8x80xf32> to vector<64x80xf32>
    %c4 = arith.constant 4 : index
    %c0_31 = arith.constant 0 : index
    %c0_32 = arith.constant 0 : index
    %46 = vector.load %arg5[%c4, %c0_31, %c0_32] : memref<9x80x64xf32, #tpu.memory_space<vmem>>, vector<1x80x64xf32>
    %47 = vector.shape_cast %46 : vector<1x80x64xf32> to vector<80x64xf32>
    %cst_33 = arith.constant dense<0.000000e+00> : vector<64x64xf32>
    %48 = tpu.matmul %45, %47, %cst_33 {dimension_numbers = #tpu.dot_dimension_numbers<[1], [0], [0], [1], [0, 0, 1, 1], [], []>} : vector<64x80xf32>, vector<80x64xf32>, vector<64x64xf32> -> vector<64x64xf32>
    %49 = arith.addf %43, %48 : vector<64x64xf32>
    %50 = vector.extract_strided_slice %18 {offsets = [1, 2, 0], sizes = [8, 8, 80], strides = [1, 1, 1]} : vector<10x10x80xf32> to vector<8x8x80xf32>
    %51 = vector.shape_cast %50 : vector<8x8x80xf32> to vector<64x80xf32>
    %c5 = arith.constant 5 : index
    %c0_34 = arith.constant 0 : index
    %c0_35 = arith.constant 0 : index
    %52 = vector.load %arg5[%c5, %c0_34, %c0_35] : memref<9x80x64xf32, #tpu.memory_space<vmem>>, vector<1x80x64xf32>
    %53 = vector.shape_cast %52 : vector<1x80x64xf32> to vector<80x64xf32>
    %cst_36 = arith.constant dense<0.000000e+00> : vector<64x64xf32>
    %54 = tpu.matmul %51, %53, %cst_36 {dimension_numbers = #tpu.dot_dimension_numbers<[1], [0], [0], [1], [0, 0, 1, 1], [], []>} : vector<64x80xf32>, vector<80x64xf32>, vector<64x64xf32> -> vector<64x64xf32>
    %55 = arith.addf %49, %54 : vector<64x64xf32>
    %56 = vector.extract_strided_slice %18 {offsets = [2, 0, 0], sizes = [8, 8, 80], strides = [1, 1, 1]} : vector<10x10x80xf32> to vector<8x8x80xf32>
    %57 = vector.shape_cast %56 : vector<8x8x80xf32> to vector<64x80xf32>
    %c6 = arith.constant 6 : index
    %c0_37 = arith.constant 0 : index
    %c0_38 = arith.constant 0 : index
    %58 = vector.load %arg5[%c6, %c0_37, %c0_38] : memref<9x80x64xf32, #tpu.memory_space<vmem>>, vector<1x80x64xf32>
    %59 = vector.shape_cast %58 : vector<1x80x64xf32> to vector<80x64xf32>
    %cst_39 = arith.constant dense<0.000000e+00> : vector<64x64xf32>
    %60 = tpu.matmul %57, %59, %cst_39 {dimension_numbers = #tpu.dot_dimension_numbers<[1], [0], [0], [1], [0, 0, 1, 1], [], []>} : vector<64x80xf32>, vector<80x64xf32>, vector<64x64xf32> -> vector<64x64xf32>
    %61 = arith.addf %55, %60 : vector<64x64xf32>
    %62 = vector.extract_strided_slice %18 {offsets = [2, 1, 0], sizes = [8, 8, 80], strides = [1, 1, 1]} : vector<10x10x80xf32> to vector<8x8x80xf32>
    %63 = vector.shape_cast %62 : vector<8x8x80xf32> to vector<64x80xf32>
    %c7 = arith.constant 7 : index
    %c0_40 = arith.constant 0 : index
    %c0_41 = arith.constant 0 : index
    %64 = vector.load %arg5[%c7, %c0_40, %c0_41] : memref<9x80x64xf32, #tpu.memory_space<vmem>>, vector<1x80x64xf32>
    %65 = vector.shape_cast %64 : vector<1x80x64xf32> to vector<80x64xf32>
    %cst_42 = arith.constant dense<0.000000e+00> : vector<64x64xf32>
    %66 = tpu.matmul %63, %65, %cst_42 {dimension_numbers = #tpu.dot_dimension_numbers<[1], [0], [0], [1], [0, 0, 1, 1], [], []>} : vector<64x80xf32>, vector<80x64xf32>, vector<64x64xf32> -> vector<64x64xf32>
    %67 = arith.addf %61, %66 : vector<64x64xf32>
    %68 = vector.extract_strided_slice %18 {offsets = [2, 2, 0], sizes = [8, 8, 80], strides = [1, 1, 1]} : vector<10x10x80xf32> to vector<8x8x80xf32>
    %69 = vector.shape_cast %68 : vector<8x8x80xf32> to vector<64x80xf32>
    %c8_43 = arith.constant 8 : index
    %c0_44 = arith.constant 0 : index
    %c0_45 = arith.constant 0 : index
    %70 = vector.load %arg5[%c8_43, %c0_44, %c0_45] : memref<9x80x64xf32, #tpu.memory_space<vmem>>, vector<1x80x64xf32>
    %71 = vector.shape_cast %70 : vector<1x80x64xf32> to vector<80x64xf32>
    %cst_46 = arith.constant dense<0.000000e+00> : vector<64x64xf32>
    %72 = tpu.matmul %69, %71, %cst_46 {dimension_numbers = #tpu.dot_dimension_numbers<[1], [0], [0], [1], [0, 0, 1, 1], [], []>} : vector<64x80xf32>, vector<80x64xf32>, vector<64x64xf32> -> vector<64x64xf32>
    %73 = arith.addf %67, %72 : vector<64x64xf32>
    %c0_47 = arith.constant 0 : index
    %c0_48 = arith.constant 0 : index
    %c0_49 = arith.constant 0 : index
    %c0_50 = arith.constant 0 : index
    %74 = vector.load %arg2[%c0_47, %c0_48, %c0_49, %c0_50] : memref<1x8x8x32xf32, #tpu.memory_space<vmem>>, vector<1x8x8x32xf32>
    %75 = vector.shape_cast %74 : vector<1x8x8x32xf32> to vector<8x8x32xf32>
    %76 = vector.shape_cast %75 : vector<8x8x32xf32> to vector<64x32xf32>
    %c0_51 = arith.constant 0 : index
    %c0_52 = arith.constant 0 : index
    %77 = vector.load %arg6[%c0_51, %c0_52] : memref<32x64xf32, #tpu.memory_space<vmem>>, vector<32x64xf32>
    %cst_53 = arith.constant dense<0.000000e+00> : vector<64x64xf32>
    %78 = tpu.matmul %76, %77, %cst_53 {dimension_numbers = #tpu.dot_dimension_numbers<[1], [0], [0], [1], [0, 0, 1, 1], [], []>} : vector<64x32xf32>, vector<32x64xf32>, vector<64x64xf32> -> vector<64x64xf32>
    %c0_54 = arith.constant 0 : index
    %c0_55 = arith.constant 0 : index
    %79 = vector.load %arg7[%c0_54, %c0_55] : memref<1x64xf32, #tpu.memory_space<vmem>>, vector<1x64xf32>
    %80 = vector.broadcast %79 : vector<1x64xf32> to vector<64x64xf32>
    %81 = arith.mulf %78, %80 : vector<64x64xf32>
    %c0_56 = arith.constant 0 : index
    %c0_57 = arith.constant 0 : index
    %82 = vector.load %arg8[%c0_56, %c0_57] : memref<1x64xf32, #tpu.memory_space<vmem>>, vector<1x64xf32>
    %83 = vector.broadcast %82 : vector<1x64xf32> to vector<64x64xf32>
    %84 = arith.addf %81, %83 : vector<64x64xf32>
    %cst_58 = arith.constant 0.000000e+00 : f32
    %85 = vector.broadcast %cst_58 : f32 to vector<64x64xf32>
    %86 = arith.cmpf oge, %84, %85 : vector<64x64xf32>
    %cst_59 = arith.constant 0.00999999977 : f32
    %87 = vector.broadcast %cst_59 : f32 to vector<64x64xf32>
    %88 = arith.mulf %87, %84 : vector<64x64xf32>
    %89 = arith.select %86, %84, %88 : vector<64x64xi1>, vector<64x64xf32>
    %90 = arith.addf %73, %89 : vector<64x64xf32>
    %91 = vector.shape_cast %90 : vector<64x64xf32> to vector<1x8x8x64xf32>
    %c0_60 = arith.constant 0 : index
    %c0_61 = arith.constant 0 : index
    %c0_62 = arith.constant 0 : index
    %c0_63 = arith.constant 0 : index
    %92 = vector.load %arg9[%c0_60, %c0_61, %c0_62, %c0_63] : memref<1x8x8x64xf32, #tpu.memory_space<vmem>>, vector<1x8x8x64xf32>
    tpu.vector_store %arg9[%c0_60, %c0_61, %c0_62, %c0_63], %91 {strides = array<i32>} : memref<1x8x8x64xf32, #tpu.memory_space<vmem>>, vector<1x8x8x64xf32>,
    return
  }
  func.func @transform_0(%arg0: i32) -> (i32, i32, i32, i32) {
    %c0_i32 = arith.constant 0 : i32
    %c0_i32_0 = arith.constant 0 : i32
    %c0_i32_1 = arith.constant 0 : i32
    %c0_i32_2 = arith.constant 0 : i32
    return %arg0, %c0_i32, %c0_i32_0, %c0_i32_1 : i32, i32, i32, i32
  }
  func.func @transform_1(%arg0: i32) -> (i32, i32, i32, i32) {
    %c0_i32 = arith.constant 0 : i32
    %c0_i32_0 = arith.constant 0 : i32
    %c0_i32_1 = arith.constant 0 : i32
    %c0_i32_2 = arith.constant 0 : i32
    return %arg0, %c0_i32, %c0_i32_0, %c0_i32_1 : i32, i32, i32, i32
  }
  func.func @transform_2(%arg0: i32) -> (i32, i32) {
    %c0_i32 = arith.constant 0 : i32
    %c0_i32_0 = arith.constant 0 : i32
    %c0_i32_1 = arith.constant 0 : i32
    return %c0_i32, %c0_i32_0 : i32, i32
  }
  func.func @transform_3(%arg0: i32) -> (i32, i32) {
    %c0_i32 = arith.constant 0 : i32
    %c0_i32_0 = arith.constant 0 : i32
    %c0_i32_1 = arith.constant 0 : i32
    return %c0_i32, %c0_i32_0 : i32, i32
  }
  func.func @transform_4(%arg0: i32) -> (i32, i32, i32) {
    %c0_i32 = arith.constant 0 : i32
    %c0_i32_0 = arith.constant 0 : i32
    %c0_i32_1 = arith.constant 0 : i32
    %c0_i32_2 = arith.constant 0 : i32
    return %c0_i32, %c0_i32_0, %c0_i32_1 : i32, i32, i32
  }
  func.func @transform_5(%arg0: i32) -> (i32, i32) {
    %c0_i32 = arith.constant 0 : i32
    %c0_i32_0 = arith.constant 0 : i32
    %c0_i32_1 = arith.constant 0 : i32
    return %c0_i32, %c0_i32_0 : i32, i32
  }
  func.func @transform_6(%arg0: i32) -> (i32, i32) {
    %c0_i32 = arith.constant 0 : i32
    %c0_i32_0 = arith.constant 0 : i32
    %c0_i32_1 = arith.constant 0 : i32
    return %c0_i32, %c0_i32_0 : i32, i32
  }
  func.func @transform_7(%arg0: i32) -> (i32, i32) {
    %c0_i32 = arith.constant 0 : i32
    %c0_i32_0 = arith.constant 0 : i32
    %c0_i32_1 = arith.constant 0 : i32
    return %c0_i32, %c0_i32_0 : i32, i32
  }
  func.func @transform_8(%arg0: i32) -> (i32, i32, i32, i32) {
    %c0_i32 = arith.constant 0 : i32
    %c0_i32_0 = arith.constant 0 : i32
    %c0_i32_1 = arith.constant 0 : i32
    %c0_i32_2 = arith.constant 0 : i32
    return %arg0, %c0_i32, %c0_i32_0, %c0_i32_1 : i32, i32, i32, i32
  }
}

</mosaic_0001>

<bundles_post_ra>
// kernel: tile.38
= control target key start
LH: loop header
LB: loop body
LE: loop exit
PB: predicated region body
PF: predicated region fallthrough
CT: control target
= control target key end

     0   :  { %s22_s0 = inlined_call_operand.vmem [shape: f32[4], index: 0, kind: input, shape index: {}]   ;;  %s23_s1 = inlined_call_operand.vmem [shape: f32[8,4], index: 1, kind: output, shape index: {}]  }
   0x1   :  { %v4_v0 = vld [vmem:[%s22_s0] ss:$0 sm:$0xff] }
   0x2   :  { %5 = vst [vmem:[%s23_s1] sm:$0xff] %v4_v0 }

// kernel: tile.39
= control target key start
LH: loop header
LB: loop body
LE: loop exit
PB: predicated region body
PF: predicated region fallthrough
CT: control target
= control target key end

     0   :  { %s67_s10 = smov 28   ;;  %s68_s11 = smov 20   ;;  %vm3_vm0 = vcmask 31744   ;;  %vm9_vm1 = vcmask 261344   ;;  %vm15_vm2 = vcmask 228544   ;;  %vm21_vm3 = vcmask 195744   ;;  %s111_s0 = inlined_call_operand.vmem [shape: f32[8,4], index: 0, kind: input, shape index: {}]   ;;  %s112_s1 = inlined_call_operand.vmem [shape: f32[1,32], index: 1, kind: output, shape index: {}]  }
   0x1   :  { %v53_v0 = vld [vmem:[%s111_s0 + $0x7] sm:$0x1]   ;;  %v55_v1 = vld [vmem:[%s111_s0 + $0x5] sm:$0x1]   ;;  %v54_v2 = vld [vmem:[%s111_s0 + $0x6] sm:$0x1]  }
   0x2   :  { %7 = vrot.lane.b32.xlu0 %v53_v0, %s67_s10  ;;  %19 = vrot.lane.b32.xlu1 %v55_v1, %s68_s11  ;;  %v56_v3 = vld [vmem:[%s111_s0 + $0x4] sm:$0x1]   ;;  %v2_v4 = vld [vmem:[%s111_s0] sm:$0x1]   ;;  %s69_s18 = smov 24   ;;  %s70_s19 = smov 16  }
   0x3   :  { %4 = vst.msk [vmem:[#allocation0] sm:$0x1] %vm3_vm0, %v2_v4   ;;  %v57_v5 = vld [vmem:[%s111_s0 + $0x3] sm:$0x1]   ;;  %v58_v6 = vld [vmem:[%s111_s0 + $0x2] sm:$0x1]  }
   0x4   :  { %s71_s24 = smov 12   ;;  %s72_s25 = smov 8   ;;  %v59_v7 = vld [vmem:[%s111_s0 + $0x1] sm:$0x1]   ;;  %vm27_vm4 = vcmask 162944   ;;  %vm33_vm5 = vcmask 130144  }
   0x5   :  { %s73_s0 = smov 4   ;;  %vm39_vm6 = vcmask 97344   ;;  %vm45_vm7 = vcmask 64544  }
   0x6   :  { %13 = vrot.lane.b32.xlu0 %v54_v2, %s69_s18  ;;  %25 = vrot.lane.b32.xlu1 %v56_v3, %s70_s19 }
   0xa   :  { %31 = vrot.lane.b32.xlu0 %v57_v5, %s71_s24  ;;  %37 = vrot.lane.b32.xlu1 %v58_v6, %s72_s25 }
   0xe   :  { %43 = vrot.lane.b32.xlu0 %v59_v7, %s73_s0 }
  0x74   :  { %v8_v8 = vpop.permute.xlu0 %7   ;;  %v20_v9 = vpop.permute.xlu1 %19  }
  0x75   :  { %10 = vst.msk [vmem:[#allocation0] sm:$0x1] %vm9_vm1, %v8_v8  }
  0x78   :  { %v14_v10 = vpop.permute.xlu0 %13   ;;  %v26_v11 = vpop.permute.xlu1 %25  }
  0x79   :  { %16 = vst.msk [vmem:[#allocation0] sm:$0x1] %vm15_vm2, %v14_v10  }
  0x7a   :  { %22 = vst.msk [vmem:[#allocation0] sm:$0x1] %vm21_vm3, %v20_v9  }
  0x7b   :  { %28 = vst.msk [vmem:[#allocation0] sm:$0x1] %vm27_vm4, %v26_v11  }
  0x7c   :  { %v32_v12 = vpop.permute.xlu0 %31   ;;  %v38_v13 = vpop.permute.xlu1 %37  }
  0x7d   :  { %34 = vst.msk [vmem:[#allocation0] sm:$0x1] %vm33_vm5, %v32_v12  }
  0x7e   :  { %40 = vst.msk [vmem:[#allocation0] sm:$0x1] %vm39_vm6, %v38_v13  }
  0x80   :  { %v44_v14 = vpop.permute.xlu0 %43  }
  0x81   :  { %46 = vst.msk [vmem:[#allocation0] sm:$0x1] %vm45_vm7, %v44_v14  }
  0x88   :  { %v50_v15 = vld [vmem:[#allocation0] sm:$0x1] }
  0x89   :  { %52 = vst [vmem:[%s112_s1] sm:$0x1] %v50_v15 }

// kernel: tile.58
= control target key start
LH: loop header
LB: loop body
LE: loop exit
PB: predicated region body
PF: predicated region fallthrough
CT: control target
= control target key end

     0   :  { %s22_s0 = inlined_call_operand.vmem [shape: f32[8], index: 0, kind: input, shape index: {}]   ;;  %s23_s1 = inlined_call_operand.vmem [shape: f32[8,8], index: 1, kind: output, shape index: {}]  }
   0x1   :  { %v4_v0 = vld [vmem:[%s22_s0] ss:$0 sm:$0xff] }
   0x2   :  { %5 = vst [vmem:[%s23_s1] sm:$0xff] %v4_v0 }

// kernel: tile.59
= control target key start
LH: loop header
LB: loop body
LE: loop exit
PB: predicated region body
PF: predicated region fallthrough
CT: control target
= control target key end

     0   :  { %s67_s10 = smov 56   ;;  %s68_s11 = smov 40   ;;  %vm3_vm0 = vcmask 64512   ;;  %vm9_vm1 = vcmask 523712   ;;  %vm15_vm2 = vcmask 458112   ;;  %vm21_vm3 = vcmask 392512   ;;  %s111_s0 = inlined_call_operand.vmem [shape: f32[8,8], index: 0, kind: input, shape index: {}]   ;;  %s112_s1 = inlined_call_operand.vmem [shape: f32[1,64], index: 1, kind: output, shape index: {}]  }
   0x1   :  { %v53_v0 = vld [vmem:[%s111_s0 + $0x7] sm:$0x1]   ;;  %v55_v1 = vld [vmem:[%s111_s0 + $0x5] sm:$0x1]   ;;  %v54_v2 = vld [vmem:[%s111_s0 + $0x6] sm:$0x1]  }
   0x2   :  { %7 = vrot.lane.b32.xlu0 %v53_v0, %s67_s10  ;;  %19 = vrot.lane.b32.xlu1 %v55_v1, %s68_s11  ;;  %v56_v3 = vld [vmem:[%s111_s0 + $0x4] sm:$0x1]   ;;  %v2_v4 = vld [vmem:[%s111_s0] sm:$0x1]   ;;  %s69_s18 = smov 48   ;;  %s70_s19 = smov 32  }
   0x3   :  { %4 = vst.msk [vmem:[#allocation0] sm:$0x1] %vm3_vm0, %v2_v4   ;;  %v57_v5 = vld [vmem:[%s111_s0 + $0x3] sm:$0x1]   ;;  %v58_v6 = vld [vmem:[%s111_s0 + $0x2] sm:$0x1]  }
   0x4   :  { %s71_s24 = smov 24   ;;  %s72_s25 = smov 16   ;;  %v59_v7 = vld [vmem:[%s111_s0 + $0x1] sm:$0x1]   ;;  %vm27_vm4 = vcmask 326912   ;;  %vm33_vm5 = vcmask 261312  }
   0x5   :  { %s73_s0 = smov 8   ;;  %vm39_vm6 = vcmask 195712   ;;  %vm45_vm7 = vcmask 130112  }
   0x6   :  { %13 = vrot.lane.b32.xlu0 %v54_v2, %s69_s18  ;;  %25 = vrot.lane.b32.xlu1 %v56_v3, %s70_s19 }
   0xa   :  { %31 = vrot.lane.b32.xlu0 %v57_v5, %s71_s24  ;;  %37 = vrot.lane.b32.xlu1 %v58_v6, %s72_s25 }
   0xe   :  { %43 = vrot.lane.b32.xlu0 %v59_v7, %s73_s0 }
  0x74   :  { %v8_v8 = vpop.permute.xlu0 %7   ;;  %v20_v9 = vpop.permute.xlu1 %19  }
  0x75   :  { %10 = vst.msk [vmem:[#allocation0] sm:$0x1] %vm9_vm1, %v8_v8  }
  0x78   :  { %v14_v10 = vpop.permute.xlu0 %13   ;;  %v26_v11 = vpop.permute.xlu1 %25  }
  0x79   :  { %16 = vst.msk [vmem:[#allocation0] sm:$0x1] %vm15_vm2, %v14_v10  }
  0x7a   :  { %22 = vst.msk [vmem:[#allocation0] sm:$0x1] %vm21_vm3, %v20_v9  }
  0x7b   :  { %28 = vst.msk [vmem:[#allocation0] sm:$0x1] %vm27_vm4, %v26_v11  }
  0x7c   :  { %v32_v12 = vpop.permute.xlu0 %31   ;;  %v38_v13 = vpop.permute.xlu1 %37  }
  0x7d   :  { %34 = vst.msk [vmem:[#allocation0] sm:$0x1] %vm33_vm5, %v32_v12  }
  0x7e   :  { %40 = vst.msk [vmem:[#allocation0] sm:$0x1] %vm39_vm6, %v38_v13  }
  0x80   :  { %v44_v14 = vpop.permute.xlu0 %43  }
  0x81   :  { %46 = vst.msk [vmem:[#allocation0] sm:$0x1] %vm45_vm7, %v44_v14  }
  0x88   :  { %v50_v15 = vld [vmem:[#allocation0] sm:$0x1] }
  0x89   :  { %52 = vst [vmem:[%s112_s1] sm:$0x1] %v50_v15 }

// kernel: preact_resblock_down.2
= control target key start
LH: loop header
LB: loop body
LE: loop exit
PB: predicated region body
PF: predicated region fallthrough
CT: control target
= control target key end

     0   :  { %s2807_s30 = smov 0   ;;  %s3405_s0 = inlined_call_operand.vmem [shape: f32[2,8,8,32], index: 0, kind: input, shape index: {}]   ;;  %s3406_s1 = inlined_call_operand.vmem [shape: f32[1,32], index: 1, kind: input, shape index: {}]   ;;  %s3407_s2 = inlined_call_operand.vmem [shape: f32[1,32], index: 2, kind: input, shape index: {}]   ;;  %s3408_s3 = inlined_call_operand.vmem [shape: f32[9,40,64], index: 3, kind: input, shape index: {}]   ;;  %s3409_s4 = inlined_call_operand.vmem [shape: f32[32,64], index: 4, kind: input, shape index: {}]   ;;  %s3410_s5 = inlined_call_operand.vmem [shape: f32[2,8,8,64], index: 5, kind: output, shape index: {0}]   ;;  %s3411_s6 = inlined_call_operand.vmem [shape: f32[2,1,64], index: 6, kind: output, shape index: {1}]   ;;  %s3412_s7 = inlined_call_operand.vmem [shape: f32[2,1,64], index: 7, kind: output, shape index: {2}]   ;;  %s3413_s8 = inlined_call_operand.vmem [shape: f32[2,1,64], index: 8, kind: output, shape index: {3}]   ;;  %s3414_s9 = inlined_call_operand.vmem [shape: f32[2,1,64], index: 9, kind: output, shape index: {4}]  }
   0x1 LB: > { %s2111_s10 = sadd.s32 4294967295, %s2753_s30   ;;  %p2115_p0 = scmp.ge.s32.totalorder %s2753_s30, 1  ;;  %s2753_s30 = sphi %s2807_s30, %s20_s30  }
   0x2   : > { %p296_p1 = scmp.lt.s32.totalorder %s2753_s30, 3 }
   0x4   : > { %p297_p2 = pnand %p2115_p0, %p296_p1 }
   0x5   : > { %p344_p3 = scmp.lt.s32.totalorder (!%p297_p2), %s2111_s10, 1  ;;  %vm428_vm0 = vcmask (!%p297_p2), 326656   ;;  %vm430_vm1 = vcmask (!%p297_p2), 320512   ;;  %v2122_v0 = vld [vmem:[%s3408_s3 + $0x28] sm:$0xff] (!%p297_p2)  ;;  %v2123_v1 = vld [vmem:[%s3408_s3 + $0x30] sm:$0xff] (!%p297_p2)  ;;  %v2755_v2 = vmov (!%p297_p2), 0.0  }
   0x6   : > { %300 = sbr.rel (%p297_p2) target bundleno = 467 (0x1d3), region = 40  ;;  %432 = vst.msk [vmem:[#allocation2 + $0x10] sm:$0xff] (!%p297_p2), %vm428_vm0, %v2755_v2  ;;  %429 = vst.msk [vmem:[#allocation2] sm:$0xff] (!%p297_p2), %vm428_vm0, %v2755_v2  ;;  %v2593_v3 = vpack.c.bf16 (!%p297_p2), %v2123_v1, %v2122_v0  ;;  %v2169_v4 = vld [vmem:[%s3408_s3 + $0xa0] sm:$0xff] (!%p297_p2)  ;;  %v2170_v5 = vld [vmem:[%s3408_s3 + $0xa8] sm:$0xff] (!%p297_p2)  ;;  %s2756_s20 = smov (!%p297_p2), 4  }
   0x7   : > { %433 = vst.msk [vmem:[#allocation2 + $0x18] sm:$0x3] (!%p297_p2), %vm430_vm1, %v2755_v2  ;;  %431 = vst.msk [vmem:[#allocation2 + $0x8] sm:$0x3] (!%p297_p2), %vm430_vm1, %v2755_v2  ;;  %v2124_v6 = vld [vmem:[%s3408_s3 + $0x38] sm:$0xff] (!%p297_p2)  ;;  %v2625_v8 = vpack.c.bf16 (!%p297_p2), %v2170_v5, %v2169_v4  ;;  %v2125_v9 = vld [vmem:[%s3408_s3 + $0x40] sm:$0xff] (!%p297_p2) }
   0x8   : > { %434 = vst.msk [vmem:[#allocation2 + $0x20] sm:$0xff] (!%p297_p2), %vm428_vm0, %v2755_v2  ;;  %436 = vst.msk [vmem:[#allocation2 + $0x30] sm:$0xff] (!%p297_p2), %vm428_vm0, %v2755_v2  ;;  %v2120_v7 = vld [vmem:[%s3406_s1] ss:$0 sm:$0xff] (!%p297_p2)  ;;  %2594 = vmatprep.subr.bf16.mxu1 (!%p297_p2), %v2593_v3  ;;  %v2597_v11 = vpack.c.bf16 (!%p297_p2), %v2125_v9, %v2124_v6  ;;  %v2171_v12 = vld [vmem:[%s3408_s3 + $0xb0] sm:$0xff] (!%p297_p2)  ;;  %vm533_vm6 = vcmask (!%p297_p2), 1046528  }
   0x9   : > { %435 = vst.msk [vmem:[#allocation2 + $0x28] sm:$0x3] (!%p297_p2), %vm430_vm1, %v2755_v2  ;;  %437 = vst.msk [vmem:[#allocation2 + $0x38] sm:$0x3] (!%p297_p2), %vm430_vm1, %v2755_v2  ;;  %v2121_v10 = vld [vmem:[%s3407_s2] ss:$0 sm:$0xff] (!%p297_p2)  ;;  %2596 = vmatpush3.bf16.msra.mxu1 (!%p297_p2), %v2593_v3  ;;  %2626 = vmatprep.subr.bf16.mxu0 (!%p297_p2), %v2625_v8 }
   0xa   : > { %438 = vst.msk [vmem:[#allocation2 + $0x40] sm:$0xff] (!%p297_p2), %vm428_vm0, %v2755_v2  ;;  %440 = vst.msk [vmem:[#allocation2 + $0x50] sm:$0xff] (!%p297_p2), %vm428_vm0, %v2755_v2  ;;  %v2172_v13 = vld [vmem:[%s3408_s3 + $0xb8] sm:$0xff] (!%p297_p2)  ;;  %2598 = vmatprep.subr.bf16.mxu1 (!%p297_p2), %v2597_v11  ;;  %2628 = vmatpush3.bf16.msra.mxu0 (!%p297_p2), %v2625_v8  ;;  %v2126_v33 = vld [vmem:[%s3408_s3 + $0x48] sm:$0xff] (!%p297_p2)  ;;  %vm483_vm11 = vcmask (!%p297_p2), 293920   ;;  %vm806_vm12 = vcmask (!%p297_p2), 1045504  }
   0xb   : > { %439 = vst.msk [vmem:[#allocation2 + $0x48] sm:$0x3] (!%p297_p2), %vm430_vm1, %v2755_v2  ;;  %441 = vst.msk [vmem:[#allocation2 + $0x58] sm:$0x3] (!%p297_p2), %vm430_vm1, %v2755_v2  ;;  %v2629_v17 = vpack.c.bf16 (!%p297_p2), %v2172_v13, %v2171_v12  ;;  %v2173_v46 = vld [vmem:[%s3408_s3 + $0xc0] sm:$0xff] (!%p297_p2)  ;;  %v2182_v53 = vld [vmem:[%s3408_s3 + $0xc8] sm:$0xff] (!%p297_p2) }
   0xc   : > { %442 = vst.msk [vmem:[#allocation2 + $0x60] sm:$0xff] (!%p297_p2), %vm428_vm0, %v2755_v2  ;;  %444 = vst.msk [vmem:[#allocation2 + $0x70] sm:$0xff] (!%p297_p2), %vm428_vm0, %v2755_v2  ;;  %v2183_v54 = vld [vmem:[%s3408_s3 + $0xd0] sm:$0xff] (!%p297_p2)  ;;  %v512_v57 = vld [vmem:[%s3408_s3] sm:$0xff] (!%p297_p2)  ;;  %vm1774_vm13 = vcmask (!%p297_p2), 261120   ;;  %vm1708_vm14 = vcmask (!%p297_p2), 523264  }
   0xd   : > { %s3416_s10 = smov (!%p344_p3, %s2111_s10), 1  ;;  %443 = vst.msk [vmem:[#allocation2 + $0x68] sm:$0x3] %vm430_vm1, %v2755_v2  ;;  %445 = vst.msk [vmem:[#allocation2 + $0x78] sm:$0x3] %vm430_vm1, %v2755_v2  ;;  %2630 = vmatprep.subr.bf16.mxu0 %v2629_v17  ;;  %2600 = vmatpush3.bf16.msra.mxu1 %v2597_v11  ;;  %v2900_v44 = vld [vmem:[#allocation2] sm:$0xff]  ;;  %v2926_v60 = vpack.c.bf16 %v2183_v54, %v2182_v53 }
   0xe   : > { %446 = vst.msk [vmem:[#allocation2 + $0x80] sm:$0xff] %vm428_vm0, %v2755_v2  ;;  %448 = vst.msk [vmem:[#allocation2 + $0x90] sm:$0xff] %vm428_vm0, %v2755_v2  ;;  %s2244_s21 = sshll.u32 %s3416_s10, 6  ;;  %2383 = vmatprep.subr.mxu1 %v2126_v33  ;;  %2632 = vmatpush3.bf16.msra.mxu0 %v2629_v17  ;;  %v2902_v45 = vld [vmem:[#allocation2 + $0x8] sm:$0x3]  ;;  %v534_v55 = vrot.slane %v2900_v44, 1  ;;  %s362_s13 = scalar_lea.vmem %s3413_s8, %s3416_s10 }
   0xf   : > { %447 = vst.msk [vmem:[#allocation2 + $0x88] sm:$0x3] %vm430_vm1, %v2755_v2  ;;  %449 = vst.msk [vmem:[#allocation2 + $0x98] sm:$0x3] %vm430_vm1, %v2755_v2  ;;  %s348_s28 = scalar_lea.vmem %s3405_s0, %s2244_s21  ;;  %2471 = vmatprep.subr.mxu0 %v2173_v46  ;;  %v535_v56 = vrot.slane %v2902_v45, 1  ;;  %v513_v58 = vld [vmem:[%s3408_s3 + $0x8] sm:$0xff]  ;;  %s3331_s11 = scalar_lea.vmem %s3410_s5, %s2244_s21 }
  0x10   : > { %v2873_v14 = vld [vmem:[%s348_s28] sm:$0xff]  ;;  %v2875_v15 = vld [vmem:[%s348_s28 + $0x10] sm:$0xff]  ;;  %v2877_v16 = vld [vmem:[%s348_s28 + $0x8] sm:$0xff]  ;;  %v2601_v61 = vpack.c.bf16 %v513_v58, %v512_v57  ;;  %vm1738_vm15 = vcmask 516096   ;;  %s365_s16 = scalar_lea.vmem %s3414_s9, %s3416_s10  ;;  %s356_s19 = scalar_lea.vmem %s3411_s6, %s3416_s10 }
  0x11   : > { %v381_v18 = vmul.f32 %v2120_v7, %v2873_v14  ;;  %v383_v19 = vmul.f32 %v2120_v7, %v2875_v15  ;;  %v382_v20 = vmul.f32 %v2120_v7, %v2877_v16  ;;  %v2882_v21 = vld [vmem:[%s348_s28 + $0x18] sm:$0xff]  ;;  %v2884_v22 = vld [vmem:[%s348_s28 + $0x20] sm:$0xff]  ;;  %v2886_v23 = vld [vmem:[%s348_s28 + $0x28] sm:$0xff]  ;;  %2384 = vmatpush3.msra.mxu1 %v2126_v33  ;;  %v536_v59 = vsel %vm533_vm6, %v534_v55, %v535_v56  ;;  %s359_s23 = scalar_lea.vmem %s3412_s7, %s3416_s10 }
  0x12   : > { %v384_v24 = vmul.f32 %v2120_v7, %v2882_v21  ;;  %v385_v25 = vmul.f32 %v2120_v7, %v2884_v22  ;;  %v386_v26 = vmul.f32 %v2120_v7, %v2886_v23  ;;  %v2891_v27 = vld [vmem:[%s348_s28 + $0x30] sm:$0xff]  ;;  %v2893_v28 = vld [vmem:[%s348_s28 + $0x38] sm:$0xff]  ;;  %2472 = vmatpush3.msra.mxu0 %v2173_v46  ;;  %2385 = vmatprep.mubr.msk.f32.mxu1 %vm428_vm0, %v536_v59 }
  0x13   : > { %v396_v29 = vadd.f32 %v2121_v10, %v381_v18  ;;  %v398_v30 = vadd.f32 %v2121_v10, %v383_v19  ;;  %v397_v31 = vadd.f32 %v2121_v10, %v382_v20  ;;  %v387_v32 = vmul.f32 %v2120_v7, %v2891_v27  ;;  %2634 = vmatprep.subr.bf16.mxu0 %v2926_v60  ;;  %v514_v8 = vld [vmem:[%s3408_s3 + $0x10] sm:$0xff]  ;;  %v515_v9 = vld [vmem:[%s3408_s3 + $0x18] sm:$0xff] }
  0x14   : > { %v399_v34 = vadd.f32 %v2121_v10, %v384_v24  ;;  %v400_v35 = vadd.f32 %v2121_v10, %v385_v25  ;;  %v401_v36 = vadd.f32 %v2121_v10, %v386_v26  ;;  %v388_v37 = vmul.f32 %v2120_v7, %v2893_v28  ;;  %2602 = vmatprep.subr.bf16.mxu1 %v2601_v61  ;;  %v2144_v57 = vld [vmem:[%s3408_s3 + $0x58] sm:$0xff] }
  0x15   : > { %vm404_vm2 = vcmp.ge.f32.partialorder %v396_v29, 0.0  ;;  %v412_v38 = vmul.f32 0.01, %v396_v29  ;;  %vm406_vm3 = vcmp.ge.f32.partialorder %v398_v30, 0.0  ;;  %v414_v39 = vmul.f32 0.01, %v398_v30 }
  0x16   : > { %vm405_vm4 = vcmp.ge.f32.partialorder %v397_v31, 0.0  ;;  %v413_v40 = vmul.f32 0.01, %v397_v31  ;;  %vm407_vm5 = vcmp.ge.f32.partialorder %v399_v34, 0.0  ;;  %v415_v41 = vmul.f32 0.01, %v399_v34 }
  0x17   : > { %v420_v42 = vsel %vm404_vm2, %v396_v29, %v412_v38  ;;  %v422_v43 = vsel %vm406_vm3, %v398_v30, %v414_v39  ;;  %v416_v49 = vmul.f32 0.01, %v400_v35  ;;  %v417_v50 = vmul.f32 0.01, %v401_v36  ;;  %v2184_v30 = vld [vmem:[%s3408_s3 + $0xd8] sm:$0xff] }
  0x18   : > { %458 = vrot.lane.b32.xlu0 %v420_v42, %s2756_s20  ;;  %462 = vrot.lane.b32.xlu1 %v422_v43, %s2756_s20  ;;  %v421_v47 = vsel %vm405_vm4, %v397_v31, %v413_v40  ;;  %v423_v48 = vsel %vm407_vm5, %v399_v34, %v415_v41  ;;  %v402_v51 = vadd.f32 %v2121_v10, %v387_v32  ;;  %vm408_vm7 = vcmp.ge.f32.partialorder %v400_v35, 0.0  ;;  %v2185_v31 = vld [vmem:[%s3408_s3 + $0xe0] sm:$0xff] }
  0x19   : > { %v403_v52 = vadd.f32 %v2121_v10, %v388_v37  ;;  %vm409_vm8 = vcmp.ge.f32.partialorder %v401_v36, 0.0  ;;  %v424_v62 = vsel %vm408_vm7, %v400_v35, %v416_v49  ;;  %v2605_v26 = vpack.c.bf16 %v515_v9, %v514_v8 }
  0x1a   : > { %v425_v63 = vsel %vm409_vm8, %v401_v36, %v417_v50  ;;  %v418_v0 = vmul.f32 0.01, %v402_v51  ;;  %vm410_vm9 = vcmp.ge.f32.partialorder %v402_v51, 0.0  ;;  %v2637_v46 = vpack.c.bf16 %v2185_v31, %v2184_v30  ;;  %v2197_v31 = vld [vmem:[%s3408_s3 + $0x100] sm:$0xff] }
  0x1b   : > { %v419_v1 = vmul.f32 0.01, %v403_v52  ;;  %vm411_vm10 = vcmp.ge.f32.partialorder %v403_v52, 0.0 }
  0x1c   : > { %460 = vrot.lane.b32.xlu0 %v421_v47, %s2756_s20  ;;  %464 = vrot.lane.b32.xlu1 %v423_v48, %s2756_s20  ;;  %v426_v2 = vsel %vm410_vm9, %v402_v51, %v418_v0  ;;  %v516_v47 = vld [vmem:[%s3408_s3 + $0x20] sm:$0xff]  ;;  %v2143_v48 = vld [vmem:[%s3408_s3 + $0x50] sm:$0xff] }
  0x1d   : > { %v427_v3 = vsel %vm411_vm10, %v403_v52, %v419_v1 }
  0x20   : > { %466 = vrot.lane.b32.xlu0 %v424_v62, %s2756_s20  ;;  %468 = vrot.lane.b32.xlu1 %v425_v63, %s2756_s20  ;;  %v2196_v62 = vld [vmem:[%s3408_s3 + $0xf8] sm:$0xff] }
  0x24   : > { %470 = vrot.lane.b32.xlu0 %v426_v2, %s2756_s20  ;;  %472 = vrot.lane.b32.xlu1 %v427_v3, %s2756_s20  ;;  %v2609_v3 = vpack.c.bf16 %v2144_v57, %v2143_v48  ;;  %v2156_v48 = vld [vmem:[%s3408_s3 + $0x78] sm:$0xff] }
  0x8a   : > { %v459_v4 = vpop.permute.xlu0 %458  ;;  %v463_v5 = vpop.permute.xlu1 %462 }
  0x8b   : > { %484 = vst.msk [vmem:[#allocation2 + $0x11] sm:$0xff] %vm483_vm11, %v459_v4  ;;  %486 = vst.msk [vmem:[#allocation2 + $0x31] sm:$0xff] %vm483_vm11, %v463_v5 }
  0x8e   : > { %v461_v6 = vpop.permute.xlu0 %460  ;;  %v465_v7 = vpop.permute.xlu1 %464 }
  0x8f   : > { %485 = vst.msk [vmem:[#allocation2 + $0x21] sm:$0xff] %vm483_vm11, %v461_v6  ;;  %487 = vst.msk [vmem:[#allocation2 + $0x41] sm:$0xff] %vm483_vm11, %v465_v7 }
  0x92   : > { %v467_v10 = vpop.permute.xlu0 %466  ;;  %v469_v11 = vpop.permute.xlu1 %468  ;;  %v2944_v12 = vld [vmem:[#allocation2 + $0x10] sm:$0xff]  ;;  %v2946_v13 = vld [vmem:[#allocation2 + $0x18] sm:$0x3] }
  0x93   : > { %v2948_v17 = vld [vmem:[#allocation2 + $0x30] sm:$0xff]  ;;  %488 = vst.msk [vmem:[#allocation2 + $0x51] sm:$0xff] %vm483_vm11, %v467_v10  ;;  %489 = vst.msk [vmem:[#allocation2 + $0x61] sm:$0xff] %vm483_vm11, %v469_v11  ;;  %v537_v18 = vrot.slane %v2944_v12, 1  ;;  %v538_v19 = vrot.slane %v2946_v13, 1  ;;  %v810_v11 = vrot.slane %v2944_v12, 2 }
  0x94   : > { %v2954_v20 = vld [vmem:[#allocation2 + $0x38] sm:$0x3]  ;;  %v543_v24 = vrot.slane %v2948_v17, 1 }
  0x95   : > { %v544_v25 = vrot.slane %v2954_v20, 1  ;;  %v539_v29 = vsel %vm533_vm6, %v537_v18, %v538_v19  ;;  %v811_v18 = vrot.slane %v2946_v13, 2  ;;  %v2145_v19 = vld [vmem:[%s3408_s3 + $0x60] sm:$0xff] }
  0x96   : > { %2386 = vmatmul.mubr.msk.f32.vlgmr.msra.gmra.mrb[0].mxu1 %vm428_vm0, %v539_v29  ;;  %2473 = vmatprep.mubr.msk.f32.mxu0 %vm428_vm0, %v539_v29  ;;  %v471_v32 = vpop.permute.xlu0 %470  ;;  %v473_v33 = vpop.permute.xlu1 %472  ;;  %v2967_v34 = vld [vmem:[#allocation2 + $0x20] sm:$0xff]  ;;  %v2969_v35 = vld [vmem:[#allocation2 + $0x28] sm:$0x3] }
  0x97   : > { %v2971_v36 = vld [vmem:[#allocation2 + $0x40] sm:$0xff]  ;;  %490 = vst.msk [vmem:[#allocation2 + $0x71] sm:$0xff] %vm483_vm11, %v471_v32  ;;  %491 = vst.msk [vmem:[#allocation2 + $0x81] sm:$0xff] %vm483_vm11, %v473_v33  ;;  %v540_v37 = vrot.slane %v2967_v34, 1  ;;  %v541_v38 = vrot.slane %v2969_v35, 1  ;;  %2604 = vmatpush3.bf16.msra.mxu1 %v2601_v61  ;;  %v2981_v41 = vsel %vm533_vm6, %v543_v24, %v544_v25  ;;  %v2195_v61 = vld [vmem:[%s3408_s3 + $0xf0] sm:$0xff]  ;;  %v3084_v30 = vsel %vm806_vm12, %v810_v11, %v811_v18 }
  0x98   : > { %v2977_v39 = vld [vmem:[#allocation2 + $0x48] sm:$0x3]  ;;  %v546_v40 = vrot.slane %v2971_v36, 1  ;;  %2606 = vmatprep.subr.bf16.mxu1 %v2605_v26  ;;  %v2641_v10 = vpack.c.bf16 %v2196_v62, %v2195_v61  ;;  %v814_v13 = vrot.slane %v2969_v35, 2  ;;  %v816_v33 = vrot.slane %v2948_v17, 2  ;;  %v2208_v62 = vld [vmem:[%s3408_s3 + $0x118] sm:$0xff] }
  0x99   : > { %v547_v42 = vrot.slane %v2977_v39, 1  ;;  %v2985_v43 = vsel %vm533_vm6, %v540_v37, %v541_v38  ;;  %v2146_v24 = vld [vmem:[%s3408_s3 + $0x68] sm:$0xff]  ;;  %v817_v35 = vrot.slane %v2954_v20, 2  ;;  %v819_v38 = vrot.slane %v2971_v36, 2  ;;  %v2159_v18 = vld [vmem:[%s3408_s3 + $0x90] sm:$0xff] }
  0x9a   : > { %2388 = vmatprep.mubr.msk.f32.mxu1 %vm428_vm0, %v2985_v43  ;;  %2474 = vmatmul.mubr.msk.f32.vlgmr.msra.gmra.mrb[0].mxu0 %vm428_vm0, %v2985_v43  ;;  %v3000_v50 = vld [vmem:[#allocation2 + $0x50] sm:$0xff]  ;;  %v3002_v51 = vld [vmem:[#allocation2 + $0x58] sm:$0x3]  ;;  %v3004_v52 = vld [vmem:[#allocation2 + $0x60] sm:$0xff]  ;;  %v2613_v29 = vpack.c.bf16 %v2146_v24, %v2145_v19 }
  0x9b   : > { %v2998_v49 = vsel %vm533_vm6, %v546_v40, %v547_v42  ;;  %2636 = vmatpush3.bf16.msra.mxu0 %v2926_v60  ;;  %2389 = vmatmul.mubr.msk.f32.gmra.mrb[2].mxu1 %vm428_vm0, %v2981_v41  ;;  %v549_v53 = vrot.slane %v3000_v50, 1  ;;  %v550_v54 = vrot.slane %v3002_v51, 1  ;;  %v3011_v55 = vld [vmem:[#allocation2 + $0x68] sm:$0x3]  ;;  %v552_v56 = vrot.slane %v3004_v52, 1 }
  0x9c   : > { %2476 = vmatprep.mubr.msk.f32.mxu0 %vm428_vm0, %v2981_v41  ;;  %2391 = vmatprep.mubr.msk.f32.mxu1 %vm428_vm0, %v2998_v49  ;;  %v553_v58 = vrot.slane %v3011_v55, 1  ;;  %v2186_v60 = vld [vmem:[%s3408_s3 + $0xe8] sm:$0xff]  ;;  %v820_v40 = vrot.slane %v2977_v39, 2  ;;  %v823_v20 = vrot.slane %v3002_v51, 2  ;;  %v2147_v39 = vld [vmem:[%s3408_s3 + $0x70] sm:$0xff]  ;;  %v808_v51 = vrot.slane %v2902_v45, 2 }
  0x9d   : > { %v3023_v59 = vsel %vm533_vm6, %v549_v53, %v550_v54  ;;  %2638 = vmatprep.subr.bf16.mxu0 %v2637_v46  ;;  %2608 = vmatpush3.bf16.msra.mxu1 %v2605_v26  ;;  %v813_v26 = vrot.slane %v2967_v34, 2  ;;  %v2198_v32 = vld [vmem:[%s3408_s3 + $0x108] sm:$0xff]  ;;  %v2157_v53 = vld [vmem:[%s3408_s3 + $0x80] sm:$0xff]  ;;  %v807_v54 = vrot.slane %v2900_v44, 2  ;;  %v825_v57 = vrot.slane %v3004_v52, 2 }
  0x9e   : > { %2477 = vmatmul.mubr.msk.f32.gmra.mrb[2].mxu0 %vm428_vm0, %v2998_v49  ;;  %v3037_v63 = vsel %vm533_vm6, %v552_v56, %v553_v58  ;;  %v3039_v0 = vld [vmem:[#allocation2 + $0x70] sm:$0xff]  ;;  %v3041_v1 = vld [vmem:[#allocation2 + $0x78] sm:$0x3]  ;;  %2405 = vmatprep.subr.mxu1 %v516_v47  ;;  %v3043_v2 = vld [vmem:[#allocation2 + $0x80] sm:$0xff]  ;;  %v2645_v42 = vpack.c.bf16 %v2198_v32, %v2197_v31  ;;  %v3130_v56 = vsel %vm806_vm12, %v819_v38, %v820_v40  ;;  %v826_v58 = vrot.slane %v3011_v55, 2 }
  0x9f   : > { %2392 = vmatmul.mubr.msk.f32.gmra.mrb[4].mxu1 %vm428_vm0, %v3023_v59  ;;  %2640 = vmatpush3.bf16.msra.mxu0 %v2637_v46  ;;  %v555_v4 = vrot.slane %v3039_v0, 1  ;;  %v556_v5 = vrot.slane %v3041_v1, 1  ;;  %v3049_v6 = vld [vmem:[#allocation2 + $0x88] sm:$0x3]  ;;  %v1089_v7 = vrot.slane %v3043_v2, 1  ;;  %v3101_v37 = vsel %vm806_vm12, %v813_v26, %v814_v13  ;;  %v2209_v55 = vld [vmem:[%s3408_s3 + $0x120] sm:$0xff] }
  0xa0   : > { %2479 = vmatprep.mubr.msk.f32.mxu0 %vm428_vm0, %v3023_v59  ;;  %2394 = vmatprep.mubr.msk.f32.mxu1 %vm428_vm0, %v3037_v63  ;;  %v1090_v8 = vrot.slane %v3049_v6, 1  ;;  %v822_v46 = vrot.slane %v3000_v50, 2  ;;  %v829_v61 = vrot.slane %v3041_v1, 2  ;;  %v809_v1 = vsel %vm806_vm12, %v807_v54, %v808_v51  ;;  %v2158_v11 = vld [vmem:[%s3408_s3 + $0x88] sm:$0xff]  ;;  %v2211_v13 = vld [vmem:[%s3408_s3 + $0x130] sm:$0xff]  ;;  %v2212_v32 = vld [vmem:[%s3408_s3 + $0x138] sm:$0xff] }
  0xa1   : > { %v3058_v9 = vsel %vm533_vm6, %v555_v4, %v556_v5  ;;  %2493 = vmatprep.subr.mxu0 %v2186_v60  ;;  %2406 = vmatpush3.msra.mxu1 %v516_v47  ;;  %v3112_v47 = vsel %vm806_vm12, %v816_v33, %v817_v35  ;;  %v3158_v4 = vsel %vm806_vm12, %v825_v57, %v826_v58  ;;  %v1213_v5 = vrot.slane %v3043_v2, 2  ;;  %v2210_v24 = vld [vmem:[%s3408_s3 + $0x128] sm:$0xff]  ;;  %v2221_v33 = vld [vmem:[%s3408_s3 + $0x140] sm:$0xff] }
  0xa2   : > { %2480 = vmatmul.mubr.msk.f32.gmra.mrb[4].mxu0 %vm428_vm0, %v3037_v63  ;;  %2610 = vmatprep.subr.bf16.mxu1 %v2609_v3  ;;  %v3075_v25 = vsel %vm533_vm6, %v1089_v7, %v1090_v8  ;;  %v3137_v45 = vsel %vm806_vm12, %v822_v46, %v823_v20  ;;  %v1214_v7 = vrot.slane %v3049_v6, 2  ;;  %v2649_v8 = vpack.c.bf16 %v2209_v55, %v2208_v62  ;;  %v1771_v31 = vld [vmem:[%s3409_s4 + $0x8] sm:$0xff]  ;;  %v1773_v46 = vld [vmem:[%s3409_s4 + $0x18] sm:$0xff]  ;;  %v510_v20 = vld [vmem:[#allocation2 + $0x90] sm:$0xff] }
  0xa3   : > { %2395 = vmatmul.mubr.msk.f32.gmra.mrb[6].mxu1 %vm428_vm0, %v3058_v9  ;;  %2482 = vmatprep.mubr.msk.f32.mxu0 %vm428_vm0, %v3058_v9  ;;  %v2621_v19 = vpack.c.bf16 %v2159_v18, %v2158_v11  ;;  %v2653_v26 = vpack.c.bf16 %v2211_v13, %v2210_v24  ;;  %v2222_v35 = vld [vmem:[%s3408_s3 + $0x148] sm:$0xff] }
  0xa4   : > { %2494 = vmatpush3.msra.mxu0 %v2186_v60  ;;  %2407 = vmatprep.mubr.msk.f32.mxu1 %vm428_vm0, %v2900_v44  ;;  %v828_v60 = vrot.slane %v3039_v0, 2  ;;  %v2199_v44 = vld [vmem:[%s3408_s3 + $0x110] sm:$0xff]  ;;  %v3179_v6 = vsel %vm806_vm12, %v1213_v5, %v1214_v7  ;;  %v2657_v40 = vpack.c.bf16 %v2222_v35, %v2221_v33 }
  0xa5   : > { %2642 = vmatprep.subr.bf16.mxu0 %v2641_v10 }
  0xa6   : > { %2483 = vmatmul.mubr.msk.f32.gmra.mrb[6].mxu0 %vm428_vm0, %v3075_v25 }
  0xa7   : > { %2408 = vmatmul.mubr.msk.f32.vlgmr.msra.gmra.mrb[0].mxu1 %vm428_vm0, %v2944_v12  ;;  %2495 = vmatprep.mubr.msk.f32.mxu0 %vm428_vm0, %v3084_v30 }
  0xa8   : > { %2410 = vmatprep.mubr.msk.f32.mxu1 %vm428_vm0, %v2967_v34  ;;  %2612 = vmatpush3.bf16.msra.mxu1 %v2609_v3  ;;  %v2617_v3 = vpack.c.bf16 %v2157_v53, %v2156_v48  ;;  %v2223_v48 = vld [vmem:[%s3408_s3 + $0x150] sm:$0xff]  ;;  %v2224_v53 = vld [vmem:[%s3408_s3 + $0x158] sm:$0xff] }
  0xa9   : > { %2614 = vmatprep.subr.bf16.mxu1 %v2613_v29 }
  0xaa   : > { %2496 = vmatmul.mubr.msk.f32.vlgmr.msra.gmra.mrb[0].mxu0 %vm428_vm0, %v3101_v37 }
  0xab   : > { %2644 = vmatpush3.bf16.msra.mxu0 %v2641_v10  ;;  %2411 = vmatmul.mubr.msk.f32.gmra.mrb[2].mxu1 %vm428_vm0, %v2948_v17  ;;  %v3165_v10 = vsel %vm806_vm12, %v828_v60, %v829_v61 }
  0xac   : > { %2498 = vmatprep.mubr.msk.f32.mxu0 %vm428_vm0, %v3112_v47  ;;  %2413 = vmatprep.mubr.msk.f32.mxu1 %vm428_vm0, %v2971_v36 }
  0xad   : > { %2646 = vmatprep.subr.bf16.mxu0 %v2645_v42  ;;  %2616 = vmatpush3.bf16.msra.mxu1 %v2613_v29  ;;  %v2160_v29 = vld [vmem:[%s3408_s3 + $0x98] sm:$0xff] }
  0xae   : > { %2499 = vmatmul.mubr.msk.f32.gmra.mrb[2].mxu0 %vm428_vm0, %v3130_v56  ;;  %2427 = vmatprep.subr.mxu1 %v2147_v39 }
  0xaf   : > { %2414 = vmatmul.mubr.msk.f32.gmra.mrb[4].mxu1 %vm428_vm0, %v3000_v50  ;;  %2501 = vmatprep.mubr.msk.f32.mxu0 %vm428_vm0, %v3137_v45 }
  0xb0   : > { %2416 = vmatprep.mubr.msk.f32.mxu1 %vm428_vm0, %v3004_v52  ;;  %2648 = vmatpush3.bf16.msra.mxu0 %v2645_v42  ;;  %v1772_v42 = vld [vmem:[%s3409_s4 + $0x10] sm:$0xff] }
  0xb1   : > { %2515 = vmatprep.subr.mxu0 %v2199_v44  ;;  %2428 = vmatpush3.msra.mxu1 %v2147_v39  ;;  %v2669_v39 = vpack.c.bf16 %v1773_v46, %v1772_v42 }
  0xb2   : > { %2502 = vmatmul.mubr.msk.f32.gmra.mrb[4].mxu0 %vm428_vm0, %v3158_v4  ;;  %2618 = vmatprep.subr.bf16.mxu1 %v2617_v3 }
  0xb3   : > { %2417 = vmatmul.mubr.msk.f32.gmra.mrb[6].mxu1 %vm428_vm0, %v3039_v0  ;;  %2504 = vmatprep.mubr.msk.f32.mxu0 %vm428_vm0, %v3165_v10 }
  0xb4   : > { %2516 = vmatpush3.msra.mxu0 %v2199_v44  ;;  %2429 = vmatprep.mubr.msk.f32.mxu1 %vm428_vm0, %v809_v1 }
  0xb5   : > { %2650 = vmatprep.subr.bf16.mxu0 %v2649_v8 }
  0xb6   : > { %2505 = vmatmul.mubr.msk.f32.gmra.mrb[6].mxu0 %vm428_vm0, %v3179_v6 }
  0xb7   : > { %2430 = vmatmul.mubr.msk.f32.vlgmr.msra.gmra.mrb[0].mxu1 %vm428_vm0, %v3084_v30  ;;  %2517 = vmatprep.mubr.msk.f32.mxu0 %vm428_vm0, %v2967_v34  ;;  %v1770_v30 = vld [vmem:[%s3409_s4] sm:$0xff] }
  0xb8   : > { %2432 = vmatprep.mubr.msk.f32.mxu1 %vm428_vm0, %v3101_v37  ;;  %2620 = vmatpush3.bf16.msra.mxu1 %v2617_v3  ;;  %v2665_v38 = vpack.c.bf16 %v1771_v31, %v1770_v30 }
  0xb9   : > { %2622 = vmatprep.subr.bf16.mxu1 %v2621_v19 }
  0xba   : > { %2518 = vmatmul.mubr.msk.f32.vlgmr.msra.gmra.mrb[0].mxu0 %vm428_vm0, %v2948_v17 }
  0xbb   : > { %2652 = vmatpush3.bf16.msra.mxu0 %v2649_v8  ;;  %2433 = vmatmul.mubr.msk.f32.gmra.mrb[2].mxu1 %vm428_vm0, %v3112_v47 }
  0xbc   : > { %2520 = vmatprep.mubr.msk.f32.mxu0 %vm428_vm0, %v2971_v36  ;;  %2435 = vmatprep.mubr.msk.f32.mxu1 %vm428_vm0, %v3130_v56 }
  0xbd   : > { %2654 = vmatprep.subr.bf16.mxu0 %v2653_v26  ;;  %2624 = vmatpush3.bf16.msra.mxu1 %v2621_v19 }
  0xbe   : > { %2521 = vmatmul.mubr.msk.f32.gmra.mrb[2].mxu0 %vm428_vm0, %v3000_v50  ;;  %2449 = vmatprep.subr.mxu1 %v2160_v29 }
  0xbf   : > { %2436 = vmatmul.mubr.msk.f32.gmra.mrb[4].mxu1 %vm428_vm0, %v3137_v45  ;;  %2523 = vmatprep.mubr.msk.f32.mxu0 %vm428_vm0, %v3004_v52 }
  0xc0   : > { %2438 = vmatprep.mubr.msk.f32.mxu1 %vm428_vm0, %v3158_v4  ;;  %2656 = vmatpush3.bf16.msra.mxu0 %v2653_v26 }
  0xc1   : > { %2537 = vmatprep.subr.mxu0 %v2212_v32  ;;  %2450 = vmatpush3.msra.mxu1 %v2160_v29 }
  0xc2   : > { %2524 = vmatmul.mubr.msk.f32.gmra.mrb[4].mxu0 %vm428_vm0, %v3039_v0  ;;  %2666 = vmatprep.subr.bf16.mxu1 %v2665_v38 }
  0xc3   : > { %2439 = vmatmul.mubr.msk.f32.gmra.mrb[6].mxu1 %vm428_vm0, %v3165_v10  ;;  %2526 = vmatprep.mubr.msk.f32.mxu0 %vm428_vm0, %v3043_v2 }
  0xc4   : > { %2451 = vmatprep.mubr.msk.f32.mxu1 %vm428_vm0, %v2944_v12  ;;  %2538 = vmatpush3.msra.mxu0 %v2212_v32  ;;  %v2661_v12 = vpack.c.bf16 %v2224_v53, %v2223_v48 }
  0xc5   : > { %2658 = vmatprep.subr.bf16.mxu0 %v2657_v40 }
  0xc6   : > { %2527 = vmatmul.mubr.msk.f32.gmra.mrb[6].mxu0 %vm428_vm0, %v510_v20 }
  0xc7   : > { %2452 = vmatmul.mubr.msk.f32.vlgmr.msra.gmra.mrb[0].mxu1 %vm428_vm0, %v2967_v34  ;;  %2539 = vmatprep.mubr.msk.f32.mxu0 %vm428_vm0, %v2985_v43  ;;  %v511_v34 = vld [vmem:[#allocation2 + $0x98] sm:$0x3] }
  0xc8   : > { %2454 = vmatprep.mubr.msk.f32.mxu1 %vm428_vm0, %v2948_v17  ;;  %2668 = vmatpush3.bf16.msra.mxu1 %v2665_v38  ;;  %v2225_v17 = vld [vmem:[%s3408_s3 + $0x160] sm:$0xff] }
  0xc9   : > { %2670 = vmatprep.subr.bf16.mxu1 %v2669_v39 }
  0xca   : > { %2540 = vmatmul.mubr.msk.f32.vlgmr.msra.gmra.mrb[0].mxu0 %vm428_vm0, %v2981_v41  ;;  %v1460_v41 = vrot.slane %v510_v20, 1 }
  0xcb   : > { %2660 = vmatpush3.bf16.msra.mxu0 %v2657_v40  ;;  %2455 = vmatmul.mubr.msk.f32.gmra.mrb[2].mxu1 %vm428_vm0, %v2971_v36  ;;  %v1461_v36 = vrot.slane %v511_v34, 1 }
  0xcc   : > { %2542 = vmatprep.mubr.msk.f32.mxu0 %vm428_vm0, %v2998_v49  ;;  %2457 = vmatprep.mubr.msk.f32.mxu1 %vm428_vm0, %v3000_v50 }
  0xcd   : > { %2662 = vmatprep.subr.bf16.mxu0 %v2661_v12  ;;  %2672 = vmatpush3.bf16.msra.mxu1 %v2669_v39  ;;  %v1462_v43 = vsel %vm533_vm6, %v1460_v41, %v1461_v36 }
  0xce   : > { %2543 = vmatmul.mubr.msk.f32.gmra.mrb[2].mxu0 %vm428_vm0, %v3023_v59 }
  0xcf   : > { %2458 = vmatmul.mubr.msk.f32.gmra.mrb[4].mxu1 %vm428_vm0, %v3004_v52  ;;  %2545 = vmatprep.mubr.msk.f32.mxu0 %vm428_vm0, %v3037_v63 }
  0xd0   : > { %2460 = vmatprep.mubr.msk.f32.mxu1 %vm428_vm0, %v3039_v0  ;;  %2664 = vmatpush3.bf16.msra.mxu0 %v2661_v12 }
  0xd1   : > { %2559 = vmatprep.subr.mxu0 %v2225_v17 }
  0xd2   : > { %2546 = vmatmul.mubr.msk.f32.gmra.mrb[4].mxu0 %vm428_vm0, %v3058_v9 }
  0xd3   : > { %2461 = vmatmul.mubr.msk.f32.gmra.mrb[6].mxu1 %vm428_vm0, %v3043_v2  ;;  %2548 = vmatprep.mubr.msk.f32.mxu0 %vm428_vm0, %v3075_v25 }
  0xd4   : > { %2560 = vmatpush3.msra.mxu0 %v2225_v17  ;;  %2581 = vmatprep.mubr.msk.f32.mxu1 %vm1774_vm13, %v2873_v14  ;;  %v1584_v14 = vrot.slane %v510_v20, 2 }
  0xd6   : > { %2549 = vmatmul.mubr.msk.f32.gmra.mrb[6].mxu0 %vm428_vm0, %v1462_v43 }
  0xd7   : > { %2561 = vmatprep.mubr.msk.f32.mxu0 %vm428_vm0, %v3101_v37  ;;  %2582 = vmatmul.mubr.msk.f32.vlgmr.msra.gmra.mrb[8].mxu1 %vm1774_vm13, %v2877_v16 }
  0xd8   : > { %2584 = vmatprep.mubr.msk.f32.mxu1 %vm1774_vm13, %v2875_v15  ;;  %v1585_v15 = vrot.slane %v511_v34, 2 }
  0xda   : > { %2562 = vmatmul.mubr.msk.f32.vlgmr.msra.gmra.mrb[0].mxu0 %vm428_vm0, %v3112_v47  ;;  %v1586_v16 = vsel %vm806_vm12, %v1584_v14, %v1585_v15 }
  0xdb   : > { %2564 = vmatprep.mubr.msk.f32.mxu0 %vm428_vm0, %v3130_v56  ;;  %2585 = vmatmul.mubr.msk.f32.gmra.mrb[10].mxu1 %vm1774_vm13, %v2882_v21 }
  0xdc   : > { %2587 = vmatprep.mubr.msk.f32.mxu1 %vm1774_vm13, %v2884_v22 }
  0xde   : > { %2565 = vmatmul.mubr.msk.f32.gmra.mrb[2].mxu0 %vm428_vm0, %v3137_v45 }
  0xdf   : > { %2567 = vmatprep.mubr.msk.f32.mxu0 %vm428_vm0, %v3158_v4  ;;  %2588 = vmatmul.mubr.msk.f32.gmra.mrb[12].mxu1 %vm1774_vm13, %v2886_v23 }
  0xe0   : > { %2590 = vmatprep.mubr.msk.f32.mxu1 %vm1774_vm13, %v2891_v27 }
  0xe2   : > { %2568 = vmatmul.mubr.msk.f32.gmra.mrb[4].mxu0 %vm428_vm0, %v3165_v10 }
  0xe3   : > { %2570 = vmatprep.mubr.msk.f32.mxu0 %vm428_vm0, %v3179_v6  ;;  %2591 = vmatmul.mubr.msk.f32.gmra.mrb[14].mxu1 %vm1774_vm13, %v2893_v28 }
  0xe6   : > { %2571 = vmatmul.mubr.msk.f32.gmra.mrb[6].mxu0 %vm428_vm0, %v1586_v16 }
 0x19a   : > { %v2453_v21 = vpop.f32.mrb[0].mxu1 }
 0x19b   : > { %v1041_v22 = vpop.f32.mrb[1].mxu1 }
 0x19e   : > { %v2456_v23 = vpop.f32.mrb[2].mxu1 }
 0x19f   : > { %v1051_v49 = vpop.f32.mrb[3].mxu1 }
 0x1a2   : > { %v3315_v50 = vpop.f32.mrb[4].mxu1 }
 0x1a3   : > { %v3317_v27 = vpop.f32.mrb[5].mxu1 }
 0x1a6   : > { %v3319_v52 = vpop.f32.mrb[6].mxu1 }
 0x1a7   : > { %v3321_v59 = vpop.f32.mrb[7].mxu1 }
 0x1aa   : > { %v2583_v63 = vpop.f32.mrb[8].mxu1 }
 0x1ab   : > { %v1905_v28 = vsel %vm1708_vm14, %v2583_v63, 0.0  ;;  %v1927_v0 = vmul.f32 %v2583_v63, %v2583_v63  ;;  %v1865_v2 = vpop.f32.mrb[9].mxu1 }
 0x1ac   : > { %v1904_v9 = vsel %vm1708_vm14, %v1865_v2, 0.0  ;;  %v1926_v25 = vmul.f32 %v1865_v2, %v1865_v2 }
 0x1ad   : > { %v1935_v37 = vsel %vm1708_vm14, %v1927_v0, 0.0  ;;  %v2563_v47 = vpop.f32.mrb[0].mxu0  ;;  %v1906_v51 = vadd.f32 %v1905_v28, %v1904_v9 }
 0x1ae   : > { %v2673_v54 = vadd.f32 %v2563_v47, %v2453_v21  ;;  %v1934_v56 = vsel %vm1708_vm14, %v1926_v25, 0.0  ;;  %v1661_v57 = vpop.f32.mrb[1].mxu0  ;;  %v2586_v58 = vpop.f32.mrb[10].mxu1 }
 0x1af   : > { %v1936_v45 = vadd.f32 %v1935_v37, %v1934_v56  ;;  %v2674_v60 = vadd.f32 %v1661_v57, %v1041_v22  ;;  %v1929_v61 = vmul.f32 %v2586_v58, %v2586_v58  ;;  %v1875_v44 = vpop.f32.mrb[11].mxu1  ;;  %v1909_v7 = vsel %vm1708_vm14, %v2586_v58, 0.0 }
 0x1b0   : > { %1710 = vst.msk [vmem:[%s3331_s11 + $0x8] sm:$0xff] %vm1708_vm14, %v2673_v54  ;;  %v1718_v62 = vsel %vm1708_vm14, %v2673_v54, 0.0  ;;  %v1741_v55 = vmul.f32 %v2673_v54, %v2673_v54  ;;  %v1907_v3 = vsel %vm1708_vm14, %v1875_v44, 0.0  ;;  %v1928_v1 = vmul.f32 %v1875_v44, %v1875_v44 }
 0x1b1   : > { %1709 = vst.msk [vmem:[%s3331_s11] sm:$0xff] %vm1708_vm14, %v2674_v60  ;;  %v1717_v4 = vsel %vm1708_vm14, %v2674_v60, 0.0  ;;  %v1740_v5 = vmul.f32 %v2674_v60, %v2674_v60  ;;  %v1908_v8 = vadd.f32 %v1907_v3, %v1906_v51  ;;  %v2566_v10 = vpop.f32.mrb[2].mxu0  ;;  %v1939_v33 = vsel %vm1708_vm14, %v1929_v61, 0.0 }
 0x1b2   : > { %v1749_v11 = vsel %vm1708_vm14, %v1741_v55, 0.0  ;;  %v1719_v18 = vadd.f32 %v1718_v62, %v1717_v4  ;;  %v1937_v6 = vsel %vm1708_vm14, %v1928_v1, 0.0  ;;  %v2675_v19 = vadd.f32 %v2566_v10, %v2456_v23  ;;  %v1671_v24 = vpop.f32.mrb[3].mxu0  ;;  %v2589_v13 = vpop.f32.mrb[12].mxu1 }
 0x1b3   : > { %v1748_v26 = vsel %vm1708_vm14, %v1740_v5, 0.0  ;;  %v1938_v29 = vadd.f32 %v1937_v6, %v1936_v45  ;;  %v2676_v30 = vadd.f32 %v1671_v24, %v1051_v49  ;;  %v1885_v31 = vpop.f32.mrb[13].mxu1  ;;  %v1931_v38 = vmul.f32 %v2589_v13, %v2589_v13 }
 0x1b4   : > { %v1750_v32 = vadd.f32 %v1749_v11, %v1748_v26  ;;  %1712 = vst.msk [vmem:[%s3331_s11 + $0x18] sm:$0xff] %vm1708_vm14, %v2675_v19  ;;  %v1743_v35 = vmul.f32 %v2675_v19, %v2675_v19  ;;  %v1910_v46 = vadd.f32 %v1909_v7, %v1908_v8  ;;  %v1911_v20 = vsel %vm1708_vm14, %v1885_v31, 0.0 }
 0x1b5   : > { %1711 = vst.msk [vmem:[%s3331_s11 + $0x10] sm:$0xff] %vm1708_vm14, %v2676_v30  ;;  %v1720_v40 = vsel %vm1708_vm14, %v2676_v30, 0.0  ;;  %v1742_v42 = vmul.f32 %v2676_v30, %v2676_v30  ;;  %v2569_v39 = vpop.f32.mrb[4].mxu0  ;;  %v1722_v48 = vsel %vm1708_vm14, %v2675_v19, 0.0  ;;  %v1913_v12 = vsel %vm1708_vm14, %v2589_v13, 0.0 }
 0x1b6   : > { %v1721_v53 = vadd.f32 %v1720_v40, %v1719_v18  ;;  %v1930_v34 = vmul.f32 %v1885_v31, %v1885_v31  ;;  %v1681_v17 = vpop.f32.mrb[5].mxu0  ;;  %v2592_v41 = vpop.f32.mrb[14].mxu1  ;;  %v1912_v43 = vadd.f32 %v1911_v20, %v1910_v46  ;;  %v1940_v14 = vadd.f32 %v1939_v33, %v1938_v29 }
 0x1b7   : > { %v1751_v36 = vsel %vm1708_vm14, %v1742_v42, 0.0  ;;  %v2677_v15 = vadd.f32 %v2569_v39, %v3315_v50  ;;  %v1895_v16 = vpop.f32.mrb[15].mxu1  ;;  %v2678_v23 = vadd.f32 %v1681_v17, %v3317_v27  ;;  %v1753_v63 = vsel %vm1708_vm14, %v1743_v35, 0.0 }
 0x1b8   : > { %v1752_v21 = vadd.f32 %v1751_v36, %v1750_v32  ;;  %v1941_v22 = vsel %vm1708_vm14, %v1930_v34, 0.0  ;;  %v1723_v49 = vadd.f32 %v1722_v48, %v1721_v53  ;;  %v1943_v28 = vsel %vm1708_vm14, %v1931_v38, 0.0 }
 0x1b9   : > { %v1942_v0 = vadd.f32 %v1941_v22, %v1940_v14  ;;  %1714 = vst.msk [vmem:[%s3331_s11 + $0x28] sm:$0xff] %vm1708_vm14, %v2677_v15  ;;  %v1726_v2 = vsel %vm1708_vm14, %v2677_v15, 0.0  ;;  %v2572_v9 = vpop.f32.mrb[6].mxu0  ;;  %1713 = vst.msk [vmem:[%s3331_s11 + $0x20] sm:$0xff] %vm1708_vm14, %v2678_v23  ;;  %v1724_v50 = vsel %vm1708_vm14, %v2678_v23, 0.0  ;;  %v1744_v25 = vmul.f32 %v2678_v23, %v2678_v23 }
 0x1ba   : > { %v1754_v37 = vadd.f32 %v1753_v63, %v1752_v21  ;;  %v1933_v47 = vmul.f32 %v2592_v41, %v2592_v41  ;;  %v1691_v51 = vpop.f32.mrb[7].mxu0  ;;  %v1745_v27 = vmul.f32 %v2677_v15, %v2677_v15  ;;  %v1725_v54 = vadd.f32 %v1724_v50, %v1723_v49 }
 0x1bb   : > { %v1914_v56 = vadd.f32 %v1913_v12, %v1912_v43  ;;  %v1915_v57 = vsel %vm1708_vm14, %v1895_v16, 0.0  ;;  %v1755_v58 = vsel %vm1708_vm14, %v1744_v25, 0.0  ;;  %v1917_v45 = vsel %vm1708_vm14, %v2592_v41, 0.0 }
 0x1bc   : > { %v1932_v60 = vmul.f32 %v1895_v16, %v1895_v16  ;;  %v1944_v61 = vadd.f32 %v1943_v28, %v1942_v0  ;;  %v1756_v44 = vadd.f32 %v1755_v58, %v1754_v37  ;;  %v2679_v55 = vadd.f32 %v2572_v9, %v3319_v52 }
 0x1bd   : > { %v1916_v62 = vadd.f32 %v1915_v57, %v1914_v56  ;;  %v2680_v3 = vadd.f32 %v1691_v51, %v3321_v59  ;;  %v1947_v1 = vsel %vm1708_vm14, %v1933_v47, 0.0  ;;  %v1727_v5 = vadd.f32 %v1726_v2, %v1725_v54 }
 0x1be   : > { %v1945_v4 = vsel %vm1708_vm14, %v1932_v60, 0.0  ;;  %v1757_v7 = vsel %vm1708_vm14, %v1745_v27, 0.0  ;;  %1716 = vst.msk [vmem:[%s3331_s11 + $0x38] sm:$0xff] %vm1708_vm14, %v2679_v55  ;;  %v1747_v11 = vmul.f32 %v2679_v55, %v2679_v55  ;;  %v1730_v13 = vsel %vm1708_vm14, %v2679_v55, 0.0 }
 0x1bf   : > { %v1918_v8 = vadd.f32 %v1917_v45, %v1916_v62  ;;  %v1946_v10 = vadd.f32 %v1945_v4, %v1944_v61  ;;  %1715 = vst.msk [vmem:[%s3331_s11 + $0x30] sm:$0xff] %vm1708_vm14, %v2680_v3  ;;  %v1728_v18 = vsel %vm1708_vm14, %v2680_v3, 0.0  ;;  %v1746_v6 = vmul.f32 %v2680_v3, %v2680_v3 }
 0x1c0   : > { %v1758_v52 = vadd.f32 %v1757_v7, %v1756_v44  ;;  %v1729_v24 = vadd.f32 %v1728_v18, %v1727_v5  ;;  %v1761_v33 = vsel %vm1708_vm14, %v1747_v11, 0.0 }
 0x1c1   : > { %v1919_v19 = vrot.slane %v1918_v8, 4  ;;  %v1948_v59 = vadd.f32 %v1947_v1, %v1946_v10  ;;  %v1759_v26 = vsel %vm1708_vm14, %v1746_v6, 0.0 }
 0x1c2   : > { %v1731_v31 = vadd.f32 %v1730_v13, %v1729_v24  ;;  %v1760_v32 = vadd.f32 %v1759_v26, %v1758_v52 }
 0x1c3   : > { %v1920_v29 = vadd.f32 %v1919_v19, %v1918_v8  ;;  %v1949_v30 = vrot.slane %v1948_v59, 4 }
 0x1c4   : > { %v1732_v40 = vrot.slane %v1731_v31, 4  ;;  %v1762_v42 = vadd.f32 %v1761_v33, %v1760_v32 }
 0x1c5   : > { %v1921_v35 = vrot.slane %v1920_v29, 2  ;;  %v1950_v38 = vadd.f32 %v1949_v30, %v1948_v59 }
 0x1c6   : > { %v1733_v39 = vadd.f32 %v1732_v40, %v1731_v31  ;;  %v1763_v48 = vrot.slane %v1762_v42, 4 }
 0x1c7   : > { %v1922_v46 = vadd.f32 %v1921_v35, %v1920_v29  ;;  %v1951_v20 = vrot.slane %v1950_v38, 2 }
 0x1c8   : > { %v1734_v34 = vrot.slane %v1733_v39, 2  ;;  %v1764_v17 = vadd.f32 %v1763_v48, %v1762_v42 }
 0x1c9   : > { %v1923_v53 = vrot.slane %v1922_v46, 1  ;;  %v1952_v12 = vadd.f32 %v1951_v20, %v1950_v38 }
 0x1ca   : > { %v1735_v43 = vadd.f32 %v1734_v34, %v1733_v39  ;;  %v1765_v14 = vrot.slane %v1764_v17, 2 }
 0x1cb   : > { %v1924_v41 = vadd.f32 %v1923_v53, %v1922_v46  ;;  %v1953_v36 = vrot.slane %v1952_v12, 1 }
 0x1cc   : > { %v1736_v16 = vrot.slane %v1735_v43, 1  ;;  %v1766_v21 = vadd.f32 %v1765_v14, %v1764_v17 }
 0x1cd   : > { %1925 = vst.msk [vmem:[%s362_s13] sm:$0x1] %vm1738_vm15, %v1924_v41  ;;  %v1954_v15 = vadd.f32 %v1953_v36, %v1952_v12 }
 0x1ce   : > { %v1737_v22 = vadd.f32 %v1736_v16, %v1735_v43  ;;  %v1767_v23 = vrot.slane %v1766_v21, 1 }
 0x1cf   : > { %1955 = vst.msk [vmem:[%s365_s16] sm:$0x1] %vm1738_vm15, %v1954_v15 }
 0x1d0   : > { %1739 = vst.msk [vmem:[%s356_s19] sm:$0x1] %vm1738_vm15, %v1737_v22  ;;  %v1768_v49 = vadd.f32 %v1767_v23, %v1766_v21 }
 0x1d2   : > { %1769 = vst.msk [vmem:[%s359_s23] sm:$0x1] %vm1738_vm15, %v1768_v49 }
 0x1d3 PF: > { %s20_s30 = sadd.s32 1, %s2753_s30  }
 0x1d4   : > { %p17_p4 = scmp.ge.s32.totalorder %s20_s30, 4  }
 0x1d6   :  { %19 = sbr.rel (!%p17_p4) target bundleno = 1 (0x1), region = 127 }

// kernel: preact_resblock_down.3
= control target key start
LH: loop header
LB: loop body
LE: loop exit
PB: predicated region body
PF: predicated region fallthrough
CT: control target
= control target key end

     0   :  { %s2972_s27 = smov 0   ;;  %s3667_s0 = inlined_call_operand.vmem [shape: f32[2,8,8,64], index: 0, kind: input, shape index: {}]   ;;  %s3668_s1 = inlined_call_operand.vmem [shape: f32[2,8,8,32], index: 1, kind: input, shape index: {}]   ;;  %s3669_s2 = inlined_call_operand.vmem [shape: f32[1,64], index: 2, kind: input, shape index: {}]   ;;  %s3670_s3 = inlined_call_operand.vmem [shape: f32[1,64], index: 3, kind: input, shape index: {}]   ;;  %s3671_s4 = inlined_call_operand.vmem [shape: f32[9,80,64], index: 4, kind: input, shape index: {}]   ;;  %s3672_s5 = inlined_call_operand.vmem [shape: f32[32,64], index: 5, kind: input, shape index: {}]   ;;  %s3673_s6 = inlined_call_operand.vmem [shape: f32[1,64], index: 6, kind: input, shape index: {}]   ;;  %s3674_s7 = inlined_call_operand.vmem [shape: f32[1,64], index: 7, kind: input, shape index: {}]   ;;  %s3675_s8 = inlined_call_operand.vmem [shape: f32[2,8,8,64], index: 8, kind: output, shape index: {}]  }
   0x1 LB: > { %s1993_s28 = sadd.s32 4294967295, %s2923_s27   ;;  %p1997_p0 = scmp.ge.s32.totalorder %s2923_s27, 1  ;;  %s2923_s27 = sphi %s2972_s27, %s18_s27  }
   0x2   : > { %p272_p1 = scmp.lt.s32.totalorder %s2923_s27, 3 }
   0x4   : > { %p273_p2 = pnand %p1997_p0, %p272_p1 }
   0x5   : > { %p311_p3 = scmp.lt.s32.totalorder (!%p273_p2), %s1993_s28, 1  ;;  %v2006_v0 = vld [vmem:[%s3671_s4 + $0x50] sm:$0xff] (!%p273_p2)  ;;  %v2007_v1 = vld [vmem:[%s3671_s4 + $0x58] sm:$0xff] (!%p273_p2)  ;;  %v2008_v2 = vld [vmem:[%s3671_s4 + $0x60] sm:$0xff] (!%p273_p2)  ;;  %vm388_vm0 = vcmask (!%p273_p2), 654336   ;;  %vm390_vm1 = vcmask (!%p273_p2), 648192  }
   0x6   : > { %276 = sbr.rel (%p273_p2) target bundleno = 467 (0x1d3), region = 52  ;;  %v2994_v3 = vld [vmem:[%s3669_s2] ss:$0 sm:$0xff] (!%p273_p2)  ;;  %v2655_v4 = vpack.c.bf16 (!%p273_p2), %v2007_v1, %v2006_v0  ;;  %v2009_v5 = vld [vmem:[%s3671_s4 + $0x68] sm:$0xff] (!%p273_p2)  ;;  %v2925_v8 = vmov (!%p273_p2), 0.0   ;;  %v2010_v11 = vld [vmem:[%s3671_s4 + $0x70] sm:$0xff] (!%p273_p2) }
   0x7   : > { %v2068_v6 = vld [vmem:[%s3671_s4 + $0x140] sm:$0xff] (!%p273_p2)  ;;  %v2069_v7 = vld [vmem:[%s3671_s4 + $0x148] sm:$0xff] (!%p273_p2)  ;;  %392 = vst.msk [vmem:[#allocation2 + $0x10] sm:$0xff] (!%p273_p2), %vm388_vm0, %v2925_v8  ;;  %389 = vst.msk [vmem:[#allocation2] sm:$0xff] (!%p273_p2), %vm388_vm0, %v2925_v8  ;;  %v2659_v9 = vpack.c.bf16 (!%p273_p2), %v2009_v5, %v2008_v2  ;;  %vm498_vm6 = vcmask (!%p273_p2), 1046528   ;;  %s2926_s11 = smov (!%p273_p2), 8  }
   0x8   : > { %393 = vst.msk [vmem:[#allocation2 + $0x18] sm:$0x3] (!%p273_p2), %vm390_vm1, %v2925_v8  ;;  %391 = vst.msk [vmem:[#allocation2 + $0x8] sm:$0x3] (!%p273_p2), %vm390_vm1, %v2925_v8  ;;  %v2735_v10 = vpack.c.bf16 (!%p273_p2), %v2069_v7, %v2068_v6  ;;  %v2011_v12 = vld [vmem:[%s3671_s4 + $0x78] sm:$0xff] (!%p273_p2)  ;;  %v2070_v13 = vld [vmem:[%s3671_s4 + $0x150] sm:$0xff] (!%p273_p2)  ;;  %2656 = vmatprep.subr.bf16.mxu1 (!%p273_p2), %v2655_v4 }
   0x9   : > { %394 = vst.msk [vmem:[#allocation2 + $0x20] sm:$0xff] (!%p273_p2), %vm388_vm0, %v2925_v8  ;;  %396 = vst.msk [vmem:[#allocation2 + $0x30] sm:$0xff] (!%p273_p2), %vm388_vm0, %v2925_v8  ;;  %v2071_v14 = vld [vmem:[%s3671_s4 + $0x158] sm:$0xff] (!%p273_p2)  ;;  %v2012_v15 = vld [vmem:[%s3671_s4 + $0x80] sm:$0xff] (!%p273_p2)  ;;  %2658 = vmatpush3.bf16.msra.mxu1 (!%p273_p2), %v2655_v4  ;;  %v2663_v24 = vpack.c.bf16 (!%p273_p2), %v2011_v12, %v2010_v11  ;;  %vm443_vm11 = vcmask (!%p273_p2), 588864   ;;  %vm776_vm12 = vcmask (!%p273_p2), 1045504  }
   0xa   : > { %395 = vst.msk [vmem:[#allocation2 + $0x28] sm:$0x3] (!%p273_p2), %vm390_vm1, %v2925_v8  ;;  %397 = vst.msk [vmem:[#allocation2 + $0x38] sm:$0x3] (!%p273_p2), %vm390_vm1, %v2925_v8  ;;  %v2013_v16 = vld [vmem:[%s3671_s4 + $0x88] sm:$0xff] (!%p273_p2)  ;;  %2736 = vmatprep.subr.bf16.mxu0 (!%p273_p2), %v2735_v10  ;;  %v2739_v18 = vpack.c.bf16 (!%p273_p2), %v2071_v14, %v2070_v13  ;;  %v2072_v19 = vld [vmem:[%s3671_s4 + $0x160] sm:$0xff] (!%p273_p2)  ;;  %2660 = vmatprep.subr.bf16.mxu1 (!%p273_p2), %v2659_v9 }
   0xb   : > { %398 = vst.msk [vmem:[#allocation2 + $0x40] sm:$0xff] (!%p273_p2), %vm388_vm0, %v2925_v8  ;;  %400 = vst.msk [vmem:[#allocation2 + $0x50] sm:$0xff] (!%p273_p2), %vm388_vm0, %v2925_v8  ;;  %v3053_v17 = vld [vmem:[%s3670_s3] ss:$0 sm:$0xff] (!%p273_p2)  ;;  %v2073_v20 = vld [vmem:[%s3671_s4 + $0x168] sm:$0xff] (!%p273_p2)  ;;  %2738 = vmatpush3.bf16.msra.mxu0 (!%p273_p2), %v2735_v10  ;;  %v2667_v31 = vpack.c.bf16 (!%p273_p2), %v2013_v16, %v2012_v15  ;;  %vm1725_vm13 = vcmask (!%p273_p2), 261120  }
   0xc   : > { %399 = vst.msk [vmem:[#allocation2 + $0x48] sm:$0x3] (!%p273_p2), %vm390_vm1, %v2925_v8  ;;  %401 = vst.msk [vmem:[#allocation2 + $0x58] sm:$0x3] (!%p273_p2), %vm390_vm1, %v2925_v8  ;;  %2740 = vmatprep.subr.bf16.mxu0 (!%p273_p2), %v2739_v18  ;;  %v2743_v37 = vpack.c.bf16 (!%p273_p2), %v2073_v20, %v2072_v19  ;;  %v2014_v49 = vld [vmem:[%s3671_s4 + $0x90] sm:$0xff] (!%p273_p2)  ;;  %v2015_v50 = vld [vmem:[%s3671_s4 + $0x98] sm:$0xff] (!%p273_p2) }
   0xd   : > { %s3677_s28 = smov (!%p311_p3, %s1993_s28), 1  ;;  %402 = vst.msk [vmem:[#allocation2 + $0x60] sm:$0xff] %vm388_vm0, %v2925_v8  ;;  %404 = vst.msk [vmem:[#allocation2 + $0x70] sm:$0xff] %vm388_vm0, %v2925_v8  ;;  %2662 = vmatpush3.bf16.msra.mxu1 %v2659_v9  ;;  %v2074_v55 = vld [vmem:[%s3671_s4 + $0x170] sm:$0xff]  ;;  %v2075_v56 = vld [vmem:[%s3671_s4 + $0x178] sm:$0xff]  ;;  %vm1917_vm15 = vcmask 523264  }
   0xe   : > { %403 = vst.msk [vmem:[#allocation2 + $0x68] sm:$0x3] %vm390_vm1, %v2925_v8  ;;  %405 = vst.msk [vmem:[#allocation2 + $0x78] sm:$0x3] %vm390_vm1, %v2925_v8  ;;  %s3035_s29 = sshll.u32 %s3677_s28, 6  ;;  %2664 = vmatprep.subr.bf16.mxu1 %v2663_v24  ;;  %v3075_v46 = vld [vmem:[#allocation2] sm:$0xff]  ;;  %v2747_v4 = vpack.c.bf16 %v2075_v56, %v2074_v55 }
   0xf   : > { %406 = vst.msk [vmem:[#allocation2 + $0x80] sm:$0xff] %vm388_vm0, %v2925_v8  ;;  %408 = vst.msk [vmem:[#allocation2 + $0x90] sm:$0xff] %vm388_vm0, %v2925_v8  ;;  %s315_s16 = scalar_lea.vmem %s3667_s0, %s3035_s29  ;;  %2742 = vmatpush3.bf16.msra.mxu0 %v2739_v18  ;;  %v3089_v57 = vld [vmem:[#allocation2 + $0x8] sm:$0x3]  ;;  %v499_v0 = vrot.slane %v3075_v46, 1  ;;  %v2076_v1 = vld [vmem:[%s3671_s4 + $0x180] sm:$0xff]  ;;  %s3560_s17 = scalar_lea.vmem %s3668_s1, %s3035_s29 }
  0x10   : > { %407 = vst.msk [vmem:[#allocation2 + $0x88] sm:$0x3] %vm390_vm1, %v2925_v8  ;;  %409 = vst.msk [vmem:[#allocation2 + $0x98] sm:$0x3] %vm390_vm1, %v2925_v8  ;;  %v326_v21 = vld [vmem:[%s315_s16] sm:$0xff]  ;;  %v328_v22 = vld [vmem:[%s315_s16 + $0x10] sm:$0xff]  ;;  %2744 = vmatprep.subr.bf16.mxu0 %v2743_v37  ;;  %s3642_s13 = scalar_lea.vmem %s3675_s8, %s3035_s29 }
  0x11   : > { %v327_v23 = vld [vmem:[%s315_s16 + $0x8] sm:$0xff]  ;;  %v341_v25 = vmul.f32 %v2994_v3, %v326_v21  ;;  %v343_v26 = vmul.f32 %v2994_v3, %v328_v22  ;;  %v329_v28 = vld [vmem:[%s315_s16 + $0x18] sm:$0xff]  ;;  %v330_v29 = vld [vmem:[%s315_s16 + $0x20] sm:$0xff]  ;;  %2666 = vmatpush3.bf16.msra.mxu1 %v2663_v24  ;;  %v500_v5 = vrot.slane %v3089_v57, 1 }
  0x12   : > { %v342_v27 = vmul.f32 %v2994_v3, %v327_v23  ;;  %v331_v30 = vld [vmem:[%s315_s16 + $0x28] sm:$0xff]  ;;  %v344_v32 = vmul.f32 %v2994_v3, %v329_v28  ;;  %v345_v33 = vmul.f32 %v2994_v3, %v330_v29  ;;  %v332_v35 = vld [vmem:[%s315_s16 + $0x30] sm:$0xff]  ;;  %v333_v36 = vld [vmem:[%s315_s16 + $0x38] sm:$0xff]  ;;  %2668 = vmatprep.subr.bf16.mxu1 %v2667_v31 }
  0x13   : > { %v346_v34 = vmul.f32 %v2994_v3, %v331_v30  ;;  %v356_v38 = vadd.f32 %v3053_v17, %v341_v25  ;;  %v358_v39 = vadd.f32 %v3053_v17, %v343_v26  ;;  %v347_v41 = vmul.f32 %v2994_v3, %v332_v35  ;;  %2746 = vmatpush3.bf16.msra.mxu0 %v2743_v37  ;;  %v2077_v2 = vld [vmem:[%s3671_s4 + $0x188] sm:$0xff]  ;;  %v472_v6 = vld [vmem:[%s3671_s4] sm:$0xff]  ;;  %v2086_v11 = vld [vmem:[%s3671_s4 + $0x190] sm:$0xff] }
  0x14   : > { %v357_v40 = vadd.f32 %v3053_v17, %v342_v27  ;;  %v359_v42 = vadd.f32 %v3053_v17, %v344_v32  ;;  %v360_v43 = vadd.f32 %v3053_v17, %v345_v33  ;;  %v348_v45 = vmul.f32 %v2994_v3, %v333_v36  ;;  %v473_v7 = vld [vmem:[%s3671_s4 + $0x8] sm:$0xff]  ;;  %v2087_v12 = vld [vmem:[%s3671_s4 + $0x198] sm:$0xff]  ;;  %2748 = vmatprep.subr.bf16.mxu0 %v2747_v4  ;;  %v474_v24 = vld [vmem:[%s3671_s4 + $0x10] sm:$0xff] }
  0x15   : > { %v361_v44 = vadd.f32 %v3053_v17, %v346_v34  ;;  %vm364_vm2 = vcmp.ge.f32.partialorder %v356_v38, 0.0  ;;  %v372_v47 = vmul.f32 0.01, %v356_v38  ;;  %vm366_vm3 = vcmp.ge.f32.partialorder %v358_v39, 0.0  ;;  %2670 = vmatpush3.bf16.msra.mxu1 %v2667_v31  ;;  %v475_v25 = vld [vmem:[%s3671_s4 + $0x18] sm:$0xff]  ;;  %v476_v35 = vld [vmem:[%s3671_s4 + $0x20] sm:$0xff] }
  0x16   : > { %v374_v48 = vmul.f32 0.01, %v358_v39  ;;  %vm365_vm4 = vcmp.ge.f32.partialorder %v357_v40, 0.0  ;;  %v373_v51 = vmul.f32 0.01, %v357_v40  ;;  %vm367_vm5 = vcmp.ge.f32.partialorder %v359_v42, 0.0 }
  0x17   : > { %v375_v52 = vmul.f32 0.01, %v359_v42  ;;  %v380_v53 = vsel %vm364_vm2, %v356_v38, %v372_v47  ;;  %vm368_vm7 = vcmp.ge.f32.partialorder %v360_v43, 0.0  ;;  %v376_v60 = vmul.f32 0.01, %v360_v43  ;;  %2750 = vmatpush3.bf16.msra.mxu0 %v2747_v4 }
  0x18   : > { %v382_v54 = vsel %vm366_vm3, %v358_v39, %v374_v48  ;;  %418 = vrot.lane.b32.xlu0 %v380_v53, %s2926_s11  ;;  %v381_v58 = vsel %vm365_vm4, %v357_v40, %v373_v51  ;;  %v377_v61 = vmul.f32 0.01, %v361_v44  ;;  %v362_v62 = vadd.f32 %v3053_v17, %v347_v41  ;;  %v477_v39 = vld [vmem:[%s3671_s4 + $0x28] sm:$0xff]  ;;  %v2088_v40 = vld [vmem:[%s3671_s4 + $0x1a0] sm:$0xff] }
  0x19   : > { %422 = vrot.lane.b32.xlu1 %v382_v54, %s2926_s11  ;;  %v383_v59 = vsel %vm367_vm5, %v359_v42, %v375_v52  ;;  %v363_v63 = vadd.f32 %v3053_v17, %v348_v45  ;;  %vm369_vm8 = vcmp.ge.f32.partialorder %v361_v44, 0.0  ;;  %v2671_v3 = vpack.c.bf16 %v2015_v50, %v2014_v49  ;;  %v2089_v41 = vld [vmem:[%s3671_s4 + $0x1a8] sm:$0xff]  ;;  %v478_v54 = vld [vmem:[%s3671_s4 + $0x30] sm:$0xff] }
  0x1a   : > { %v384_v8 = vsel %vm368_vm7, %v360_v43, %v376_v60  ;;  %v501_v9 = vsel %vm498_vm6, %v499_v0, %v500_v5  ;;  %v2751_v10 = vpack.c.bf16 %v2077_v2, %v2076_v1  ;;  %v385_v13 = vsel %vm369_vm8, %v361_v44, %v377_v61  ;;  %v2090_v60 = vld [vmem:[%s3671_s4 + $0x1b0] sm:$0xff]  ;;  %v2091_v61 = vld [vmem:[%s3671_s4 + $0x1b8] sm:$0xff] }
  0x1b   : > { %v378_v14 = vmul.f32 0.01, %v362_v62  ;;  %v379_v15 = vmul.f32 0.01, %v363_v63  ;;  %2672 = vmatprep.subr.bf16.mxu1 %v2671_v3  ;;  %v2675_v16 = vpack.c.bf16 %v473_v7, %v472_v6  ;;  %vm370_vm9 = vcmp.ge.f32.partialorder %v362_v62, 0.0  ;;  %2367 = vmatprep.mubr.msk.f32.mxu1 %vm388_vm0, %v501_v9 }
  0x1c   : > { %420 = vrot.lane.b32.xlu0 %v381_v58, %s2926_s11  ;;  %vm371_vm10 = vcmp.ge.f32.partialorder %v363_v63, 0.0  ;;  %2674 = vmatpush3.bf16.msra.mxu1 %v2671_v3  ;;  %v3120_v17 = vpack.c.bf16 %v2087_v12, %v2086_v11  ;;  %v2679_v34 = vpack.c.bf16 %v475_v25, %v474_v24  ;;  %v2683_v52 = vpack.c.bf16 %v477_v39, %v476_v35  ;;  %v481_v11 = vld [vmem:[%s3671_s4 + $0x48] sm:$0xff]  ;;  %v2092_v12 = vld [vmem:[%s3671_s4 + $0x1c0] sm:$0xff]  ;;  %v2034_v39 = vld [vmem:[%s3671_s4 + $0xb0] sm:$0xff] }
  0x1d   : > { %424 = vrot.lane.b32.xlu1 %v383_v59, %s2926_s11  ;;  %2752 = vmatprep.subr.bf16.mxu0 %v2751_v10  ;;  %v386_v18 = vsel %vm370_vm9, %v362_v62, %v378_v14  ;;  %v387_v19 = vsel %vm371_vm10, %v363_v63, %v379_v15  ;;  %v2759_v58 = vpack.c.bf16 %v2089_v41, %v2088_v40  ;;  %v479_v59 = vld [vmem:[%s3671_s4 + $0x38] sm:$0xff]  ;;  %v2105_v41 = vld [vmem:[%s3671_s4 + $0x1e8] sm:$0xff] }
  0x1e   : > { %2676 = vmatprep.subr.bf16.mxu1 %v2675_v16  ;;  %2754 = vmatpush3.bf16.msra.mxu0 %v2751_v10  ;;  %v2687_v6 = vpack.c.bf16 %v479_v59, %v478_v54  ;;  %v2763_v10 = vpack.c.bf16 %v2091_v61, %v2090_v60  ;;  %v2035_v40 = vld [vmem:[%s3671_s4 + $0xb8] sm:$0xff] }
  0x1f   : > { %2756 = vmatprep.subr.bf16.mxu0 %v3120_v17  ;;  %v2107_v59 = vld [vmem:[%s3671_s4 + $0x1f8] sm:$0xff] }
  0x20   : > { %426 = vrot.lane.b32.xlu0 %v384_v8, %s2926_s11  ;;  %v480_v8 = vld [vmem:[%s3671_s4 + $0x40] sm:$0xff] }
  0x21   : > { %428 = vrot.lane.b32.xlu1 %v385_v13, %s2926_s11  ;;  %v2093_v13 = vld [vmem:[%s3671_s4 + $0x1c8] sm:$0xff] }
  0x22   : > { %v2767_v25 = vpack.c.bf16 %v2093_v13, %v2092_v12  ;;  %v778_v12 = vrot.slane %v3089_v57, 2  ;;  %v777_v13 = vrot.slane %v3075_v46, 2 }
  0x24   : > { %430 = vrot.lane.b32.xlu0 %v386_v18, %s2926_s11 }
  0x25   : > { %432 = vrot.lane.b32.xlu1 %v387_v19, %s2926_s11 }
  0x8a   : > { %v419_v20 = vpop.permute.xlu0 %418 }
  0x8b   : > { %v423_v21 = vpop.permute.xlu1 %422  ;;  %444 = vst.msk [vmem:[#allocation2 + $0x11] sm:$0xff] %vm443_vm11, %v419_v20 }
  0x8c   : > { %446 = vst.msk [vmem:[#allocation2 + $0x31] sm:$0xff] %vm443_vm11, %v423_v21 }
  0x8e   : > { %v421_v22 = vpop.permute.xlu0 %420 }
  0x8f   : > { %v425_v23 = vpop.permute.xlu1 %424  ;;  %445 = vst.msk [vmem:[#allocation2 + $0x21] sm:$0xff] %vm443_vm11, %v421_v22  ;;  %v2691_v22 = vpack.c.bf16 %v481_v11, %v480_v8  ;;  %v2109_v11 = vld [vmem:[%s3671_s4 + $0x208] sm:$0xff] }
  0x90   : > { %447 = vst.msk [vmem:[#allocation2 + $0x41] sm:$0xff] %vm443_vm11, %v425_v23 }
  0x92   : > { %v427_v26 = vpop.permute.xlu0 %426  ;;  %v3137_v28 = vld [vmem:[#allocation2 + $0x10] sm:$0xff]  ;;  %v3139_v29 = vld [vmem:[#allocation2 + $0x18] sm:$0x3] }
  0x93   : > { %v429_v27 = vpop.permute.xlu1 %428  ;;  %v3141_v30 = vld [vmem:[#allocation2 + $0x30] sm:$0xff]  ;;  %448 = vst.msk [vmem:[#allocation2 + $0x51] sm:$0xff] %vm443_vm11, %v427_v26  ;;  %v502_v31 = vrot.slane %v3137_v28, 1  ;;  %v503_v32 = vrot.slane %v3139_v29, 1  ;;  %v3147_v33 = vld [vmem:[#allocation2 + $0x38] sm:$0x3] }
  0x94   : > { %449 = vst.msk [vmem:[#allocation2 + $0x61] sm:$0xff] %vm443_vm11, %v429_v27  ;;  %v508_v37 = vrot.slane %v3141_v30, 1  ;;  %v509_v38 = vrot.slane %v3147_v33, 1  ;;  %v2032_v26 = vld [vmem:[%s3671_s4 + $0xa0] sm:$0xff]  ;;  %v2033_v27 = vld [vmem:[%s3671_s4 + $0xa8] sm:$0xff]  ;;  %v780_v35 = vrot.slane %v3137_v28, 2 }
  0x95   : > { %v504_v36 = vsel %vm498_vm6, %v502_v31, %v503_v32  ;;  %v2094_v31 = vld [vmem:[%s3671_s4 + $0x1d0] sm:$0xff]  ;;  %v2095_v32 = vld [vmem:[%s3671_s4 + $0x1d8] sm:$0xff]  ;;  %v786_v54 = vrot.slane %v3141_v30, 2 }
  0x96   : > { %2368 = vmatmul.mubr.msk.f32.vlgmr.msra.gmra.mrb[0].mxu1 %vm388_vm0, %v504_v36  ;;  %2495 = vmatprep.mubr.msk.f32.mxu0 %vm388_vm0, %v504_v36  ;;  %v431_v42 = vpop.permute.xlu0 %430  ;;  %v3166_v44 = vld [vmem:[#allocation2 + $0x20] sm:$0xff]  ;;  %v3168_v45 = vld [vmem:[#allocation2 + $0x28] sm:$0x3]  ;;  %v3187_v56 = vsel %vm498_vm6, %v508_v37, %v509_v38  ;;  %v781_v36 = vrot.slane %v3139_v29, 2  ;;  %v2695_v37 = vpack.c.bf16 %v2033_v27, %v2032_v26  ;;  %v2771_v38 = vpack.c.bf16 %v2095_v32, %v2094_v31  ;;  %v2110_v26 = vld [vmem:[%s3671_s4 + $0x210] sm:$0xff] }
  0x97   : > { %v433_v43 = vpop.permute.xlu1 %432  ;;  %v3170_v47 = vld [vmem:[#allocation2 + $0x40] sm:$0xff]  ;;  %2678 = vmatpush3.bf16.msra.mxu1 %v2675_v16  ;;  %450 = vst.msk [vmem:[#allocation2 + $0x71] sm:$0xff] %vm443_vm11, %v431_v42  ;;  %v505_v48 = vrot.slane %v3166_v44, 1  ;;  %v506_v49 = vrot.slane %v3168_v45, 1  ;;  %v3176_v50 = vld [vmem:[#allocation2 + $0x48] sm:$0x3]  ;;  %v779_v31 = vsel %vm776_vm12, %v777_v13, %v778_v12 }
  0x98   : > { %451 = vst.msk [vmem:[#allocation2 + $0x81] sm:$0xff] %vm443_vm11, %v433_v43  ;;  %v511_v51 = vrot.slane %v3170_v47, 1  ;;  %2680 = vmatprep.subr.bf16.mxu1 %v2679_v34  ;;  %v512_v53 = vrot.slane %v3176_v50, 1  ;;  %v2104_v29 = vld [vmem:[%s3671_s4 + $0x1e0] sm:$0xff]  ;;  %v3305_v42 = vsel %vm776_vm12, %v780_v35, %v781_v36  ;;  %v2699_v43 = vpack.c.bf16 %v2035_v40, %v2034_v39  ;;  %v2111_v27 = vld [vmem:[%s3671_s4 + $0x218] sm:$0xff] }
  0x99   : > { %v3184_v55 = vsel %vm498_vm6, %v505_v48, %v506_v49  ;;  %v2775_v48 = vpack.c.bf16 %v2105_v41, %v2104_v29  ;;  %v784_v49 = vrot.slane %v3168_v45, 2  ;;  %v787_v45 = vrot.slane %v3147_v33, 2  ;;  %v2051_v39 = vld [vmem:[%s3671_s4 + $0xf8] sm:$0xff]  ;;  %v2113_v29 = vld [vmem:[%s3671_s4 + $0x228] sm:$0xff]  ;;  %v2128_v13 = vld [vmem:[%s3671_s4 + $0x260] sm:$0xff] }
  0x9a   : > { %2370 = vmatprep.mubr.msk.f32.mxu1 %vm388_vm0, %v3184_v55  ;;  %2496 = vmatmul.mubr.msk.f32.vlgmr.msra.gmra.mrb[0].mxu0 %vm388_vm0, %v3184_v55  ;;  %v3202_v62 = vld [vmem:[#allocation2 + $0x50] sm:$0xff]  ;;  %v3204_v63 = vld [vmem:[#allocation2 + $0x58] sm:$0x3]  ;;  %v3210_v1 = vsel %vm498_vm6, %v511_v51, %v512_v53  ;;  %v783_v51 = vrot.slane %v3166_v44, 2  ;;  %v2037_v53 = vld [vmem:[%s3671_s4 + $0xc8] sm:$0xff]  ;;  %v789_v33 = vrot.slane %v3170_v47, 2 }
  0x9b   : > { %v3206_v0 = vld [vmem:[#allocation2 + $0x60] sm:$0xff]  ;;  %2682 = vmatpush3.bf16.msra.mxu1 %v2679_v34  ;;  %2758 = vmatpush3.bf16.msra.mxu0 %v3120_v17  ;;  %v514_v2 = vrot.slane %v3202_v62, 1  ;;  %v515_v3 = vrot.slane %v3204_v63, 1  ;;  %v3214_v4 = vld [vmem:[#allocation2 + $0x68] sm:$0x3]  ;;  %v793_v8 = vrot.slane %v3204_v63, 2 }
  0x9c   : > { %v517_v5 = vrot.slane %v3206_v0, 1  ;;  %2371 = vmatmul.mubr.msk.f32.gmra.mrb[2].mxu1 %vm388_vm0, %v3187_v56  ;;  %2684 = vmatprep.subr.bf16.mxu1 %v2683_v52  ;;  %v518_v7 = vrot.slane %v3214_v4, 1  ;;  %v3332_v61 = vsel %vm776_vm12, %v783_v51, %v784_v49  ;;  %v796_v57 = vrot.slane %v3214_v4, 2  ;;  %v2052_v49 = vld [vmem:[%s3671_s4 + $0x100] sm:$0xff]  ;;  %v2053_v51 = vld [vmem:[%s3671_s4 + $0x108] sm:$0xff]  ;;  %v2059_v12 = vld [vmem:[%s3671_s4 + $0x138] sm:$0xff] }
  0x9d   : > { %2498 = vmatprep.mubr.msk.f32.mxu0 %vm388_vm0, %v3187_v56  ;;  %2760 = vmatprep.subr.bf16.mxu0 %v2759_v58  ;;  %v3226_v9 = vsel %vm498_vm6, %v514_v2, %v515_v3  ;;  %v790_v2 = vrot.slane %v3176_v50, 2  ;;  %v792_v50 = vrot.slane %v3202_v62, 2 }
  0x9e   : > { %2499 = vmatmul.mubr.msk.f32.gmra.mrb[2].mxu0 %vm388_vm0, %v3210_v1  ;;  %2373 = vmatprep.mubr.msk.f32.mxu1 %vm388_vm0, %v3210_v1  ;;  %v3241_v14 = vld [vmem:[#allocation2 + $0x70] sm:$0xff]  ;;  %v3243_v15 = vld [vmem:[#allocation2 + $0x78] sm:$0x3]  ;;  %v3248_v17 = vsel %vm498_vm6, %v517_v5, %v518_v7  ;;  %v3347_v7 = vsel %vm776_vm12, %v786_v54, %v787_v45  ;;  %v2719_v54 = vpack.c.bf16 %v2053_v51, %v2052_v49  ;;  %v1718_v51 = vld [vmem:[%s3560_s17 + $0x28] sm:$0xff] }
  0x9f   : > { %v3245_v16 = vld [vmem:[#allocation2 + $0x80] sm:$0xff]  ;;  %2686 = vmatpush3.bf16.msra.mxu1 %v2683_v52  ;;  %2762 = vmatpush3.bf16.msra.mxu0 %v2759_v58  ;;  %v520_v18 = vrot.slane %v3241_v14, 1  ;;  %v521_v19 = vrot.slane %v3243_v15, 1  ;;  %v3252_v20 = vld [vmem:[#allocation2 + $0x88] sm:$0x3]  ;;  %v2106_v58 = vld [vmem:[%s3671_s4 + $0x1f0] sm:$0xff]  ;;  %v3364_v63 = vsel %vm776_vm12, %v789_v33, %v790_v2 }
  0xa0   : > { %v1069_v21 = vrot.slane %v3245_v16, 1  ;;  %2374 = vmatmul.mubr.msk.f32.gmra.mrb[4].mxu1 %vm388_vm0, %v3226_v9  ;;  %2688 = vmatprep.subr.bf16.mxu1 %v2687_v6  ;;  %v1070_v23 = vrot.slane %v3252_v20, 1  ;;  %v2036_v52 = vld [vmem:[%s3671_s4 + $0xc0] sm:$0xff]  ;;  %v2779_v3 = vpack.c.bf16 %v2107_v59, %v2106_v58  ;;  %v2038_v5 = vld [vmem:[%s3671_s4 + $0xd0] sm:$0xff]  ;;  %v798_v4 = vrot.slane %v3241_v14, 2  ;;  %v2055_v59 = vld [vmem:[%s3671_s4 + $0x118] sm:$0xff] }
  0xa1   : > { %2501 = vmatprep.mubr.msk.f32.mxu0 %vm388_vm0, %v3226_v9  ;;  %2764 = vmatprep.subr.bf16.mxu0 %v2763_v10  ;;  %v3261_v24 = vsel %vm498_vm6, %v520_v18, %v521_v19  ;;  %v2703_v60 = vpack.c.bf16 %v2037_v53, %v2036_v52  ;;  %v795_v19 = vrot.slane %v3206_v0, 2  ;;  %v1198_v35 = vrot.slane %v3245_v16, 2  ;;  %v2122_v52 = vld [vmem:[%s3671_s4 + $0x230] sm:$0xff]  ;;  %v2123_v53 = vld [vmem:[%s3671_s4 + $0x238] sm:$0xff] }
  0xa2   : > { %2502 = vmatmul.mubr.msk.f32.gmra.mrb[4].mxu0 %vm388_vm0, %v3248_v17  ;;  %2376 = vmatprep.mubr.msk.f32.mxu1 %vm388_vm0, %v3248_v17  ;;  %v3280_v34 = vsel %vm498_vm6, %v1069_v21, %v1070_v23  ;;  %v3379_v23 = vsel %vm776_vm12, %v792_v50, %v793_v8  ;;  %v1199_v36 = vrot.slane %v3252_v20, 2  ;;  %v2112_v20 = vld [vmem:[%s3671_s4 + $0x220] sm:$0xff]  ;;  %v2795_v45 = vpack.c.bf16 %v2123_v53, %v2122_v52  ;;  %v2054_v58 = vld [vmem:[%s3671_s4 + $0x110] sm:$0xff]  ;;  %v2127_v50 = vld [vmem:[%s3671_s4 + $0x258] sm:$0xff] }
  0xa3   : > { %2690 = vmatpush3.bf16.msra.mxu1 %v2687_v6  ;;  %2766 = vmatpush3.bf16.msra.mxu0 %v2763_v10  ;;  %v2039_v6 = vld [vmem:[%s3671_s4 + $0xd8] sm:$0xff]  ;;  %v2108_v10 = vld [vmem:[%s3671_s4 + $0x200] sm:$0xff]  ;;  %v2723_v33 = vpack.c.bf16 %v2055_v59, %v2054_v58  ;;  %v1719_v52 = vld [vmem:[%s3560_s17 + $0x30] sm:$0xff] }
  0xa4   : > { %2377 = vmatmul.mubr.msk.f32.gmra.mrb[6].mxu1 %vm388_vm0, %v3261_v24  ;;  %2692 = vmatprep.subr.bf16.mxu1 %v2691_v22  ;;  %v2707_v18 = vpack.c.bf16 %v2039_v6, %v2038_v5  ;;  %v2783_v21 = vpack.c.bf16 %v2109_v11, %v2108_v10  ;;  %v2057_v5 = vld [vmem:[%s3671_s4 + $0x128] sm:$0xff]  ;;  %v2126_v6 = vld [vmem:[%s3671_s4 + $0x250] sm:$0xff]  ;;  %v1720_v53 = vld [vmem:[%s3560_s17 + $0x38] sm:$0xff] }
  0xa5   : > { %2504 = vmatprep.mubr.msk.f32.mxu0 %vm388_vm0, %v3261_v24  ;;  %2768 = vmatprep.subr.bf16.mxu0 %v2767_v25  ;;  %v2803_v10 = vpack.c.bf16 %v2127_v50, %v2126_v6  ;;  %v2058_v11 = vld [vmem:[%s3671_s4 + $0x130] sm:$0xff] }
  0xa6   : > { %2505 = vmatmul.mubr.msk.f32.gmra.mrb[6].mxu0 %vm388_vm0, %v3280_v34  ;;  %2399 = vmatprep.mubr.msk.f32.mxu1 %vm388_vm0, %v3075_v46  ;;  %v2041_v46 = vld [vmem:[%s3671_s4 + $0xe8] sm:$0xff] }
  0xa7   : > { %2694 = vmatpush3.bf16.msra.mxu1 %v2691_v22  ;;  %2770 = vmatpush3.bf16.msra.mxu0 %v2767_v25  ;;  %v2040_v22 = vld [vmem:[%s3671_s4 + $0xe0] sm:$0xff]  ;;  %v799_v25 = vrot.slane %v3243_v15, 2  ;;  %v3395_v15 = vsel %vm776_vm12, %v795_v19, %v796_v57  ;;  %v2731_v19 = vpack.c.bf16 %v2059_v12, %v2058_v11 }
  0xa8   : > { %2527 = vmatprep.mubr.msk.f32.mxu0 %vm388_vm0, %v3305_v42  ;;  %2696 = vmatprep.subr.bf16.mxu1 %v2695_v37  ;;  %v2711_v32 = vpack.c.bf16 %v2041_v46, %v2040_v22  ;;  %v1722_v22 = vld [vmem:[%s3672_s5 + $0x8] sm:$0xff]  ;;  %v2130_v46 = vld [vmem:[%s3671_s4 + $0x270] sm:$0xff] }
  0xa9   : > { %2772 = vmatprep.subr.bf16.mxu0 %v2771_v38  ;;  %v3408_v40 = vsel %vm776_vm12, %v798_v4, %v799_v25  ;;  %v2131_v4 = vld [vmem:[%s3671_s4 + $0x278] sm:$0xff]  ;;  %v3514_v25 = vld [vmem:[#allocation2 + $0x90] sm:$0xff] }
  0xaa   : > { %2400 = vmatmul.mubr.msk.f32.vlgmr.msra.gmra.mrb[0].mxu1 %vm388_vm0, %v3137_v28 }
  0xab   : > { %2402 = vmatprep.mubr.msk.f32.mxu1 %vm388_vm0, %v3166_v44  ;;  %2698 = vmatpush3.bf16.msra.mxu1 %v2695_v37  ;;  %v2787_v37 = vpack.c.bf16 %v2111_v27, %v2110_v26  ;;  %v2811_v27 = vpack.c.bf16 %v2131_v4, %v2130_v46 }
  0xac   : > { %2774 = vmatpush3.bf16.msra.mxu0 %v2771_v38  ;;  %2700 = vmatprep.subr.bf16.mxu1 %v2699_v43  ;;  %v2050_v38 = vld [vmem:[%s3671_s4 + $0xf0] sm:$0xff] }
  0xad   : > { %2776 = vmatprep.subr.bf16.mxu0 %v2775_v48  ;;  %v2715_v41 = vpack.c.bf16 %v2051_v39, %v2050_v38  ;;  %v2142_v38 = vld [vmem:[%s3671_s4 + $0x290] sm:$0xff]  ;;  %v2143_v39 = vld [vmem:[%s3671_s4 + $0x298] sm:$0xff] }
  0xae   : > { %2403 = vmatmul.mubr.msk.f32.gmra.mrb[2].mxu1 %vm388_vm0, %v3141_v30 }
  0xaf   : > { %2528 = vmatmul.mubr.msk.f32.vlgmr.msra.gmra.mrb[0].mxu0 %vm388_vm0, %v3332_v61  ;;  %2405 = vmatprep.mubr.msk.f32.mxu1 %vm388_vm0, %v3170_v47 }
  0xb0   : > { %2702 = vmatpush3.bf16.msra.mxu1 %v2699_v43  ;;  %2530 = vmatprep.mubr.msk.f32.mxu0 %vm388_vm0, %v3347_v7  ;;  %v3420_v43 = vsel %vm776_vm12, %v1198_v35, %v1199_v36  ;;  %v2141_v35 = vld [vmem:[%s3671_s4 + $0x288] sm:$0xff] }
  0xb1   : > { %2778 = vmatpush3.bf16.msra.mxu0 %v2775_v48  ;;  %2704 = vmatprep.subr.bf16.mxu1 %v2703_v60  ;;  %v2791_v48 = vpack.c.bf16 %v2113_v29, %v2112_v20  ;;  %v2145_v20 = vld [vmem:[%s3671_s4 + $0x2a8] sm:$0xff] }
  0xb2   : > { %2406 = vmatmul.mubr.msk.f32.gmra.mrb[4].mxu1 %vm388_vm0, %v3202_v62  ;;  %2780 = vmatprep.subr.bf16.mxu0 %v2779_v3 }
  0xb3   : > { %2531 = vmatmul.mubr.msk.f32.gmra.mrb[2].mxu0 %vm388_vm0, %v3364_v63  ;;  %2408 = vmatprep.mubr.msk.f32.mxu1 %vm388_vm0, %v3206_v0 }
  0xb4   : > { %2706 = vmatpush3.bf16.msra.mxu1 %v2703_v60  ;;  %2533 = vmatprep.mubr.msk.f32.mxu0 %vm388_vm0, %v3379_v23  ;;  %v2124_v60 = vld [vmem:[%s3671_s4 + $0x240] sm:$0xff] }
  0xb5   : > { %2782 = vmatpush3.bf16.msra.mxu0 %v2779_v3  ;;  %2708 = vmatprep.subr.bf16.mxu1 %v2707_v18  ;;  %v2056_v3 = vld [vmem:[%s3671_s4 + $0x120] sm:$0xff] }
  0xb6   : > { %2409 = vmatmul.mubr.msk.f32.gmra.mrb[6].mxu1 %vm388_vm0, %v3241_v14  ;;  %2784 = vmatprep.subr.bf16.mxu0 %v2783_v21  ;;  %v2727_v8 = vpack.c.bf16 %v2057_v5, %v2056_v3 }
  0xb7   : > { %2534 = vmatmul.mubr.msk.f32.gmra.mrb[4].mxu0 %vm388_vm0, %v3395_v15  ;;  %2431 = vmatprep.mubr.msk.f32.mxu1 %vm388_vm0, %v779_v31  ;;  %v1724_v31 = vld [vmem:[%s3672_s5 + $0x18] sm:$0xff] }
  0xb8   : > { %2710 = vmatpush3.bf16.msra.mxu1 %v2707_v18  ;;  %2536 = vmatprep.mubr.msk.f32.mxu0 %vm388_vm0, %v3408_v40  ;;  %v2129_v18 = vld [vmem:[%s3671_s4 + $0x268] sm:$0xff] }
  0xb9   : > { %2786 = vmatpush3.bf16.msra.mxu0 %v2783_v21  ;;  %2712 = vmatprep.subr.bf16.mxu1 %v2711_v32  ;;  %v2807_v57 = vpack.c.bf16 %v2129_v18, %v2128_v13  ;;  %v1721_v21 = vld [vmem:[%s3672_s5] sm:$0xff] }
  0xba   : > { %2788 = vmatprep.subr.bf16.mxu0 %v2787_v37  ;;  %v2835_v26 = vpack.c.bf16 %v1722_v22, %v1721_v21 }
  0xbb   : > { %2537 = vmatmul.mubr.msk.f32.gmra.mrb[6].mxu0 %vm388_vm0, %v3420_v43 }
  0xbc   : > { %2714 = vmatpush3.bf16.msra.mxu1 %v2711_v32  ;;  %2559 = vmatprep.mubr.msk.f32.mxu0 %vm388_vm0, %v3166_v44  ;;  %v2140_v32 = vld [vmem:[%s3671_s4 + $0x280] sm:$0xff] }
  0xbd   : > { %2790 = vmatpush3.bf16.msra.mxu0 %v2787_v37  ;;  %2716 = vmatprep.subr.bf16.mxu1 %v2715_v41  ;;  %v2815_v37 = vpack.c.bf16 %v2141_v35, %v2140_v32 }
  0xbe   : > { %2792 = vmatprep.subr.bf16.mxu0 %v2791_v48 }
  0xbf   : > { %2432 = vmatmul.mubr.msk.f32.vlgmr.msra.gmra.mrb[0].mxu1 %vm388_vm0, %v3305_v42  ;;  %v2125_v42 = vld [vmem:[%s3671_s4 + $0x248] sm:$0xff] }
  0xc0   : > { %2434 = vmatprep.mubr.msk.f32.mxu1 %vm388_vm0, %v3332_v61  ;;  %2718 = vmatpush3.bf16.msra.mxu1 %v2715_v41  ;;  %v2799_v2 = vpack.c.bf16 %v2125_v42, %v2124_v60 }
  0xc1   : > { %2794 = vmatpush3.bf16.msra.mxu0 %v2791_v48  ;;  %2720 = vmatprep.subr.bf16.mxu1 %v2719_v54  ;;  %v1715_v48 = vld [vmem:[%s3560_s17 + $0x10] sm:$0xff] }
  0xc2   : > { %2796 = vmatprep.subr.bf16.mxu0 %v2795_v45 }
  0xc3   : > { %2435 = vmatmul.mubr.msk.f32.gmra.mrb[2].mxu1 %vm388_vm0, %v3347_v7 }
  0xc4   : > { %2560 = vmatmul.mubr.msk.f32.vlgmr.msra.gmra.mrb[0].mxu0 %vm388_vm0, %v3141_v30  ;;  %2437 = vmatprep.mubr.msk.f32.mxu1 %vm388_vm0, %v3364_v63 }
  0xc5   : > { %2722 = vmatpush3.bf16.msra.mxu1 %v2719_v54  ;;  %2562 = vmatprep.mubr.msk.f32.mxu0 %vm388_vm0, %v3170_v47 }
  0xc6   : > { %2798 = vmatpush3.bf16.msra.mxu0 %v2795_v45  ;;  %2724 = vmatprep.subr.bf16.mxu1 %v2723_v33 }
  0xc7   : > { %2438 = vmatmul.mubr.msk.f32.gmra.mrb[4].mxu1 %vm388_vm0, %v3379_v23  ;;  %2800 = vmatprep.subr.bf16.mxu0 %v2799_v2 }
  0xc8   : > { %2563 = vmatmul.mubr.msk.f32.gmra.mrb[2].mxu0 %vm388_vm0, %v3202_v62  ;;  %2440 = vmatprep.mubr.msk.f32.mxu1 %vm388_vm0, %v3395_v15 }
  0xc9   : > { %2726 = vmatpush3.bf16.msra.mxu1 %v2723_v33  ;;  %2565 = vmatprep.mubr.msk.f32.mxu0 %vm388_vm0, %v3206_v0  ;;  %v2167_v33 = vld [vmem:[%s3674_s7] ss:$0 sm:$0xff] }
  0xca   : > { %2802 = vmatpush3.bf16.msra.mxu0 %v2799_v2  ;;  %2728 = vmatprep.subr.bf16.mxu1 %v2727_v8 }
  0xcb   : > { %2441 = vmatmul.mubr.msk.f32.gmra.mrb[6].mxu1 %vm388_vm0, %v3408_v40  ;;  %2804 = vmatprep.subr.bf16.mxu0 %v2803_v10 }
  0xcc   : > { %2566 = vmatmul.mubr.msk.f32.gmra.mrb[4].mxu0 %vm388_vm0, %v3241_v14  ;;  %2463 = vmatprep.mubr.msk.f32.mxu1 %vm388_vm0, %v3137_v28  ;;  %v1723_v28 = vld [vmem:[%s3672_s5 + $0x10] sm:$0xff] }
  0xcd   : > { %2730 = vmatpush3.bf16.msra.mxu1 %v2727_v8  ;;  %2568 = vmatprep.mubr.msk.f32.mxu0 %vm388_vm0, %v3245_v16  ;;  %v2839_v36 = vpack.c.bf16 %v1724_v31, %v1723_v28 }
  0xce   : > { %2806 = vmatpush3.bf16.msra.mxu0 %v2803_v10  ;;  %2732 = vmatprep.subr.bf16.mxu1 %v2731_v19 }
  0xcf   : > { %2808 = vmatprep.subr.bf16.mxu0 %v2807_v57 }
  0xd0   : > { %2569 = vmatmul.mubr.msk.f32.gmra.mrb[6].mxu0 %vm388_vm0, %v3514_v25 }
  0xd1   : > { %2734 = vmatpush3.bf16.msra.mxu1 %v2731_v19  ;;  %2591 = vmatprep.mubr.msk.f32.mxu0 %vm388_vm0, %v3184_v55  ;;  %v2819_v55 = vpack.c.bf16 %v2143_v39, %v2142_v38 }
  0xd2   : > { %2810 = vmatpush3.bf16.msra.mxu0 %v2807_v57  ;;  %2836 = vmatprep.subr.bf16.mxu1 %v2835_v26 }
  0xd3   : > { %2812 = vmatprep.subr.bf16.mxu0 %v2811_v27 }
  0xd4   : > { %2464 = vmatmul.mubr.msk.f32.vlgmr.msra.gmra.mrb[0].mxu1 %vm388_vm0, %v3166_v44  ;;  %v2144_v44 = vld [vmem:[%s3671_s4 + $0x2a0] sm:$0xff] }
  0xd5   : > { %2466 = vmatprep.mubr.msk.f32.mxu1 %vm388_vm0, %v3141_v30  ;;  %2838 = vmatpush3.bf16.msra.mxu1 %v2835_v26  ;;  %v2823_v30 = vpack.c.bf16 %v2145_v20, %v2144_v44 }
  0xd6   : > { %2814 = vmatpush3.bf16.msra.mxu0 %v2811_v27  ;;  %2840 = vmatprep.subr.bf16.mxu1 %v2839_v36 }
  0xd7   : > { %2816 = vmatprep.subr.bf16.mxu0 %v2815_v37 }
  0xd8   : > { %2467 = vmatmul.mubr.msk.f32.gmra.mrb[2].mxu1 %vm388_vm0, %v3170_v47  ;;  %v471_v47 = vld [vmem:[#allocation2 + $0x98] sm:$0x3] }
  0xd9   : > { %2592 = vmatmul.mubr.msk.f32.vlgmr.msra.gmra.mrb[0].mxu0 %vm388_vm0, %v3187_v56  ;;  %2469 = vmatprep.mubr.msk.f32.mxu1 %vm388_vm0, %v3202_v62  ;;  %v2146_v56 = vld [vmem:[%s3671_s4 + $0x2b0] sm:$0xff]  ;;  %v2147_v62 = vld [vmem:[%s3671_s4 + $0x2b8] sm:$0xff]  ;;  %v1456_v29 = vrot.slane %v471_v47, 1  ;;  %v1585_v54 = vrot.slane %v471_v47, 2 }
  0xda   : > { %2594 = vmatprep.mubr.msk.f32.mxu0 %vm388_vm0, %v3210_v1  ;;  %2818 = vmatpush3.bf16.msra.mxu0 %v2815_v37  ;;  %v1455_v1 = vrot.slane %v3514_v25, 1  ;;  %v2827_v41 = vpack.c.bf16 %v2147_v62, %v2146_v56 }
  0xdb   : > { %2820 = vmatprep.subr.bf16.mxu0 %v2819_v55  ;;  %2842 = vmatpush3.bf16.msra.mxu1 %v2839_v36 }
  0xdc   : > { %2470 = vmatmul.mubr.msk.f32.gmra.mrb[4].mxu1 %vm388_vm0, %v3206_v0  ;;  %v1713_v0 = vld [vmem:[%s3560_s17] sm:$0xff] }
  0xdd   : > { %2595 = vmatmul.mubr.msk.f32.gmra.mrb[2].mxu0 %vm388_vm0, %v3226_v9  ;;  %2472 = vmatprep.mubr.msk.f32.mxu1 %vm388_vm0, %v3241_v14  ;;  %v2148_v9 = vld [vmem:[%s3671_s4 + $0x2c0] sm:$0xff]  ;;  %v2149_v14 = vld [vmem:[%s3671_s4 + $0x2c8] sm:$0xff] }
  0xde   : > { %2597 = vmatprep.mubr.msk.f32.mxu0 %vm388_vm0, %v3248_v17  ;;  %2822 = vmatpush3.bf16.msra.mxu0 %v2819_v55  ;;  %v1714_v17 = vld [vmem:[%s3560_s17 + $0x8] sm:$0xff]  ;;  %v2831_v49 = vpack.c.bf16 %v2149_v14, %v2148_v9 }
  0xdf   : > { %2824 = vmatprep.subr.bf16.mxu0 %v2823_v30 }
  0xe0   : > { %2473 = vmatmul.mubr.msk.f32.gmra.mrb[6].mxu1 %vm388_vm0, %v3245_v16  ;;  %v1457_v16 = vsel %vm498_vm6, %v1455_v1, %v1456_v29 }
  0xe1   : > { %2598 = vmatmul.mubr.msk.f32.gmra.mrb[4].mxu0 %vm388_vm0, %v3261_v24  ;;  %2643 = vmatprep.mubr.msk.f32.mxu1 %vm1725_vm13, %v1713_v0  ;;  %v1716_v24 = vld [vmem:[%s3560_s17 + $0x18] sm:$0xff] }
  0xe2   : > { %2600 = vmatprep.mubr.msk.f32.mxu0 %vm388_vm0, %v3280_v34  ;;  %2826 = vmatpush3.bf16.msra.mxu0 %v2823_v30  ;;  %v1717_v34 = vld [vmem:[%s3560_s17 + $0x20] sm:$0xff] }
  0xe3   : > { %2828 = vmatprep.subr.bf16.mxu0 %v2827_v41 }
  0xe4   : > { %2644 = vmatmul.mubr.msk.f32.vlgmr.msra.gmra.mrb[8].mxu1 %vm1725_vm13, %v1714_v17 }
  0xe5   : > { %2601 = vmatmul.mubr.msk.f32.gmra.mrb[6].mxu0 %vm388_vm0, %v1457_v16  ;;  %2646 = vmatprep.mubr.msk.f32.mxu1 %vm1725_vm13, %v1715_v48 }
  0xe6   : > { %2830 = vmatpush3.bf16.msra.mxu0 %v2827_v41  ;;  %2623 = vmatprep.mubr.msk.f32.mxu0 %vm388_vm0, %v3332_v61  ;;  %v1584_v61 = vrot.slane %v3514_v25, 2 }
  0xe7   : > { %2832 = vmatprep.subr.bf16.mxu0 %v2831_v49 }
  0xe8   : > { %2647 = vmatmul.mubr.msk.f32.gmra.mrb[10].mxu1 %vm1725_vm13, %v1716_v24 }
  0xe9   : > { %2649 = vmatprep.mubr.msk.f32.mxu1 %vm1725_vm13, %v1717_v34 }
  0xea   : > { %2834 = vmatpush3.bf16.msra.mxu0 %v2831_v49 }
  0xec   : > { %2650 = vmatmul.mubr.msk.f32.gmra.mrb[12].mxu1 %vm1725_vm13, %v1718_v51 }
  0xed   : > { %2624 = vmatmul.mubr.msk.f32.vlgmr.msra.gmra.mrb[0].mxu0 %vm388_vm0, %v3347_v7  ;;  %2652 = vmatprep.mubr.msk.f32.mxu1 %vm1725_vm13, %v1719_v52  ;;  %v1586_v7 = vsel %vm776_vm12, %v1584_v61, %v1585_v54 }
  0xee   : > { %2626 = vmatprep.mubr.msk.f32.mxu0 %vm388_vm0, %v3364_v63 }
  0xf0   : > { %2653 = vmatmul.mubr.msk.f32.gmra.mrb[14].mxu1 %vm1725_vm13, %v1720_v53 }
  0xf1   : > { %2627 = vmatmul.mubr.msk.f32.gmra.mrb[2].mxu0 %vm388_vm0, %v3379_v23 }
  0xf2   : > { %2629 = vmatprep.mubr.msk.f32.mxu0 %vm388_vm0, %v3395_v15 }
  0xf5   : > { %2630 = vmatmul.mubr.msk.f32.gmra.mrb[4].mxu0 %vm388_vm0, %v3408_v40  ;;  %v2166_v40 = vld [vmem:[%s3673_s6] ss:$0 sm:$0xff] }
  0xf6   : > { %2632 = vmatprep.mubr.msk.f32.mxu0 %vm388_vm0, %v3420_v43 }
  0xf9   : > { %2633 = vmatmul.mubr.msk.f32.gmra.mrb[6].mxu0 %vm388_vm0, %v1586_v7 }
 0x1a7   : > { %v2465_v63 = vpop.f32.mrb[0].mxu1 }
 0x1a8   : > { %v1021_v45 = vpop.f32.mrb[1].mxu1 }
 0x1ab   : > { %v2468_v58 = vpop.f32.mrb[2].mxu1 }
 0x1ac   : > { %v1031_v23 = vpop.f32.mrb[3].mxu1 }
 0x1af   : > { %v3624_v59 = vpop.f32.mrb[4].mxu1 }
 0x1b0   : > { %v3626_v60 = vpop.f32.mrb[5].mxu1 }
 0x1b3   : > { %v3628_v15 = vpop.f32.mrb[6].mxu1 }
 0x1b4   : > { %v3630_v42 = vpop.f32.mrb[7].mxu1 }
 0x1b7   : > { %v2645_v43 = vpop.f32.mrb[8].mxu1 }
 0x1b8   : > { %v1863_v2 = vmul.f32 %v2645_v43, %v2166_v40  ;;  %v1816_v3 = vpop.f32.mrb[9].mxu1 }
 0x1b9   : > { %v1862_v5 = vmul.f32 %v2166_v40, %v1816_v3 }
 0x1ba   : > { %v1878_v6 = vadd.f32 %v2167_v33, %v1863_v2 }
 0x1bb   : > { %v1877_v50 = vadd.f32 %v2167_v33, %v1862_v5  ;;  %v2648_v8 = vpop.f32.mrb[10].mxu1 }
 0x1bc   : > { %v1865_v10 = vmul.f32 %v2648_v8, %v2166_v40  ;;  %v1826_v11 = vpop.f32.mrb[11].mxu1  ;;  %v1894_v12 = vmul.f32 0.01, %v1878_v6  ;;  %vm1886_vm14 = vcmp.ge.f32.partialorder %v1878_v6, 0.0 }
 0x1bd   : > { %v1864_v13 = vmul.f32 %v2166_v40, %v1826_v11  ;;  %v1893_v19 = vmul.f32 0.01, %v1877_v50  ;;  %vm1885_vm0 = vcmp.ge.f32.partialorder %v1877_v50, 0.0 }
 0x1be   : > { %v1880_v18 = vadd.f32 %v2167_v33, %v1865_v10  ;;  %v1902_v27 = vsel %vm1886_vm14, %v1878_v6, %v1894_v12 }
 0x1bf   : > { %v1879_v57 = vadd.f32 %v2167_v33, %v1864_v13  ;;  %v2651_v21 = vpop.f32.mrb[12].mxu1  ;;  %v1901_v38 = vsel %vm1885_vm0, %v1877_v50, %v1893_v19 }
 0x1c0   : > { %v2625_v22 = vpop.f32.mrb[0].mxu0  ;;  %v1867_v46 = vmul.f32 %v2651_v21, %v2166_v40  ;;  %v1836_v4 = vpop.f32.mrb[13].mxu1  ;;  %v1896_v25 = vmul.f32 0.01, %v1880_v18  ;;  %vm1888_vm1 = vcmp.ge.f32.partialorder %v1880_v18, 0.0 }
 0x1c1   : > { %v2843_v26 = vadd.f32 %v2625_v22, %v2465_v63  ;;  %v1666_v28 = vpop.f32.mrb[1].mxu0  ;;  %v1866_v31 = vmul.f32 %v2166_v40, %v1836_v4  ;;  %v1895_v32 = vmul.f32 0.01, %v1879_v57  ;;  %vm1887_vm2 = vcmp.ge.f32.partialorder %v1879_v57, 0.0 }
 0x1c2   : > { %v1882_v35 = vadd.f32 %v2167_v33, %v1867_v46  ;;  %v2844_v36 = vadd.f32 %v1666_v28, %v1021_v45  ;;  %v1904_v62 = vsel %vm1888_vm1, %v1880_v18, %v1896_v25 }
 0x1c3   : > { %v1910_v37 = vadd.f32 %v2843_v26, %v1902_v27  ;;  %v1881_v39 = vadd.f32 %v2167_v33, %v1866_v31  ;;  %v2654_v55 = vpop.f32.mrb[14].mxu1  ;;  %v1903_v14 = vsel %vm1887_vm2, %v1879_v57, %v1895_v32 }
 0x1c4   : > { %v1909_v44 = vadd.f32 %v2844_v36, %v1901_v38  ;;  %v2628_v20 = vpop.f32.mrb[2].mxu0  ;;  %v1869_v30 = vmul.f32 %v2654_v55, %v2166_v40  ;;  %v1846_v47 = vpop.f32.mrb[15].mxu1  ;;  %v1898_v29 = vmul.f32 0.01, %v1882_v35  ;;  %vm1890_vm3 = vcmp.ge.f32.partialorder %v1882_v35, 0.0 }
 0x1c5   : > { %1919 = vst.msk [vmem:[%s3642_s13 + $0x8] sm:$0xff] %vm1917_vm15, %v1910_v37  ;;  %v2845_v56 = vadd.f32 %v2628_v20, %v2468_v58  ;;  %v1676_v1 = vpop.f32.mrb[3].mxu0  ;;  %v1868_v0 = vmul.f32 %v2166_v40, %v1846_v47  ;;  %v1897_v17 = vmul.f32 0.01, %v1881_v39  ;;  %vm1889_vm4 = vcmp.ge.f32.partialorder %v1881_v39, 0.0 }
 0x1c6   : > { %1918 = vst.msk [vmem:[%s3642_s13] sm:$0xff] %vm1917_vm15, %v1909_v44  ;;  %v1884_v41 = vadd.f32 %v2167_v33, %v1869_v30  ;;  %v2846_v9 = vadd.f32 %v1676_v1, %v1031_v23  ;;  %v1906_v53 = vsel %vm1890_vm3, %v1882_v35, %v1898_v29 }
 0x1c7   : > { %v1912_v16 = vadd.f32 %v2845_v56, %v1904_v62  ;;  %v1883_v48 = vadd.f32 %v2167_v33, %v1868_v0  ;;  %v1905_v63 = vsel %vm1889_vm4, %v1881_v39, %v1897_v17 }
 0x1c8   : > { %v1911_v49 = vadd.f32 %v2846_v9, %v1903_v14  ;;  %v2631_v24 = vpop.f32.mrb[4].mxu0  ;;  %v1900_v52 = vmul.f32 0.01, %v1884_v41  ;;  %vm1892_vm5 = vcmp.ge.f32.partialorder %v1884_v41, 0.0 }
 0x1c9   : > { %1921 = vst.msk [vmem:[%s3642_s13 + $0x18] sm:$0xff] %vm1917_vm15, %v1912_v16  ;;  %v2847_v34 = vadd.f32 %v2631_v24, %v3624_v59  ;;  %v1686_v51 = vpop.f32.mrb[5].mxu0  ;;  %v1899_v54 = vmul.f32 0.01, %v1883_v48  ;;  %vm1891_vm6 = vcmp.ge.f32.partialorder %v1883_v48, 0.0 }
 0x1ca   : > { %1920 = vst.msk [vmem:[%s3642_s13 + $0x10] sm:$0xff] %vm1917_vm15, %v1911_v49  ;;  %v2848_v61 = vadd.f32 %v1686_v51, %v3626_v60  ;;  %v1908_v40 = vsel %vm1892_vm5, %v1884_v41, %v1900_v52 }
 0x1cb   : > { %v1914_v7 = vadd.f32 %v2847_v34, %v1906_v53  ;;  %v1907_v33 = vsel %vm1891_vm6, %v1883_v48, %v1899_v54 }
 0x1cc   : > { %v1913_v45 = vadd.f32 %v2848_v61, %v1905_v63  ;;  %v2634_v58 = vpop.f32.mrb[6].mxu0 }
 0x1cd   : > { %1923 = vst.msk [vmem:[%s3642_s13 + $0x28] sm:$0xff] %vm1917_vm15, %v1914_v7  ;;  %v2849_v23 = vadd.f32 %v2634_v58, %v3628_v15  ;;  %v1696_v59 = vpop.f32.mrb[7].mxu0 }
 0x1ce   : > { %1922 = vst.msk [vmem:[%s3642_s13 + $0x20] sm:$0xff] %vm1917_vm15, %v1913_v45  ;;  %v2850_v43 = vadd.f32 %v1696_v59, %v3630_v42 }
 0x1cf   : > { %v1916_v60 = vadd.f32 %v2849_v23, %v1908_v40 }
 0x1d0   : > { %v1915_v2 = vadd.f32 %v2850_v43, %v1907_v33 }
 0x1d1   : > { %1925 = vst.msk [vmem:[%s3642_s13 + $0x38] sm:$0xff] %vm1917_vm15, %v1916_v60 }
 0x1d2   : > { %1924 = vst.msk [vmem:[%s3642_s13 + $0x30] sm:$0xff] %vm1917_vm15, %v1915_v2 }
 0x1d3 PF: > { %s18_s27 = sadd.s32 1, %s2923_s27  }
 0x1d4   : > { %p15_p4 = scmp.ge.s32.totalorder %s18_s27, 4  }
 0x1d6   :  { %17 = sbr.rel (!%p15_p4) target bundleno = 1 (0x1), region = 94 }

</bundles_post_ra>
